<compile_context>
chip_gen: v7x
topology: tpu7x:2x2x1
jax: 0.10.0
libtpu: 0.0.40
codegen_flags: <defaults>
</compile_context>

<pallas_src>
import functools

import jax
import jax.numpy as jnp
from jax.experimental import pallas as pl
from jax.experimental.pallas import tpu as pltpu


def _convlstm_kernel(p_ref, w_ref, b_ref, c_ref, out_ref, *, hid):
    """One (batch, row-band) grid step.

    p_ref   : (1, M, Kp)     bf16  im2col patches (K zero-padded to Kp)
    w_ref   : (Kp, 4*hid)    bf16  folded conv weight (K rows zero-padded)
    b_ref   : (1, 4*hid)     f32   conv bias
    c_ref   : (1, M, 4*hid)  f32   cell state, lane-replicated [c|c|c|c]
    out_ref : (1, M, 4*hid)  f32   lanes [hid,2h) = c_next, [2h,3h) = h_next
    """
    # ---- one folded-K MXU matmul: bf16 inputs, f32 accumulation ------------
    acc = jnp.dot(p_ref[0], w_ref[...], preferred_element_type=jnp.float32)
    acc = acc + b_ref[...]                          # (M, 4*hid), lanes [i|f|o|g]

    # ---- activations: ONE sigmoid pass over all 128 lanes ------------------
    # tanh(x) = 2*sigmoid(2x) - 1 on the g lanes (VPU pre-scale + fixup).
    lane = jax.lax.broadcasted_iota(jnp.int32, acc.shape, 1)
    is_g = lane >= 3 * hid
    s = jax.nn.sigmoid(jnp.where(is_g, acc + acc, acc))
    act = jnp.where(is_g, s + s - 1.0, s)           # [sig i | sig f | sig o | tanh g]

    # ---- full 128-lane gate math via static lane rotations (XLU) -----------
    # jnp.roll(x, hid, axis=1)[l] == x[l - hid]  (static shift -> lane rotate)
    c4 = c_ref[0]                                   # [c|c|c|c]
    ig = act * jnp.roll(act, hid, axis=1)           # lanes [0,h)   : i*g
    cn = act * c4 + jnp.roll(ig, hid, axis=1)       # lanes [h,2h)  : f*c + i*g
    tn = jnp.tanh(cn)                               # lanes [h,2h)  : tanh(c_next)
    hn = act * jnp.roll(tn, hid, axis=1)            # lanes [2h,3h) : o*tanh(c_next)

    # ---- merge c_next / h_next into one lane-dense slab; single unmasked
    # 128-lane store (lanes outside [h,3h) are junk the wrapper never reads).
    is_c = jnp.logical_and(lane >= hid, lane < 2 * hid)
    out_ref[0] = jnp.where(is_c, cn, hn)


def conv_lstm_cell(input_nchw, h_cur_nchw, c_cur_nchw, weight_oihw, bias,
                   kernel_size):
    """Mirrors ConvLSTMCell.forward. Inputs/outputs are NCHW like PyTorch."""
    KH, KW = kernel_size
    assert KH % 2 == 1 and KW % 2 == 1, "odd kernel assumed ('same' padding)"
    B, Ci, H, W = input_nchw.shape
    hid = h_cur_nchw.shape[1]
    Cin = Ci + hid
    K = KH * KW * Cin
    Kp = ((K + 127) // 128) * 128            # lane-dense contraction dim
    ph, pw = KH // 2, KW // 2

    # Row-band tile: largest TH dividing H with M = TH*W in a good MXU range.
    TH = H
    while TH % 2 == 0 and TH * W > 512:
        TH //= 2
    if (TH * W) % 8 != 0:
        TH = H                               # fall back: whole image per step
    n_t = H // TH
    M = TH * W

    # ---- wrapper-side im2col (fused concat + patch extraction) -------------
    x = jnp.transpose(input_nchw, (0, 2, 3, 1)).astype(jnp.bfloat16)
    h = jnp.transpose(h_cur_nchw, (0, 2, 3, 1)).astype(jnp.bfloat16)
    comb = jnp.concatenate([x, h], axis=-1)                    # (B,H,W,Cin)
    comb = jnp.pad(comb, ((0, 0), (ph, ph), (pw, pw), (0, 0)))
    cols = [comb[:, kh:kh + H, kw:kw + W, :]
            for kh in range(KH) for kw in range(KW)]
    patches = jnp.concatenate(cols, axis=-1)                   # (B,H,W,K), k=(kh,kw,c)
    patches = jnp.pad(patches, ((0, 0), (0, 0), (0, 0), (0, Kp - K)))
    patches = patches.reshape(B, H * W, Kp)                    # lane-dense blocks

    # OIHW -> (KH,KW,Cin,4*hid) -> (K,4*hid); zero-padded K rows (match the
    # zero-padded patch columns), bf16 for the MXU.
    w_folded = jnp.transpose(weight_oihw, (2, 3, 1, 0)).reshape(K, 4 * hid)
    w_folded = jnp.pad(w_folded, ((0, Kp - K), (0, 0))).astype(jnp.bfloat16)
    b2 = bias.reshape(1, 4 * hid).astype(jnp.float32)

    # Cell state, lane-replicated x4 so f*c runs at full 128-lane occupancy.
    c2 = jnp.transpose(c_cur_nchw, (0, 2, 3, 1)).astype(jnp.float32)
    c_rep = jnp.tile(c2.reshape(B, H * W, hid), (1, 1, 4))     # (B, H*W, 4*hid)

    kern = functools.partial(_convlstm_kernel, hid=hid)

    n_pix = B * H * W
    cost = pl.CostEstimate(
        flops=2 * n_pix * K * 4 * hid,
        transcendentals=2 * n_pix * 4 * hid,
        bytes_accessed=int(patches.size * 2 + w_folded.size * 2
                           + c_rep.size * 4 + b2.size * 4 + n_pix * 4 * hid * 4))

    # Per-step VMEM (double-buffered blocks) + headroom; capped under v7x's
    # 64 MiB physical VMEM.
    step_bytes = 2 * (M * Kp * 2 + Kp * 4 * hid * 2 + 4 * hid * 4
                      + 2 * M * 4 * hid * 4)
    vmem_limit = min(48 * 1024 * 1024, max(8 * 1024 * 1024, 4 * step_bytes))

    out = pl.pallas_call(
        kern,
        grid=(B, n_t),
        in_specs=[
            pl.BlockSpec((1, M, Kp), lambda b, t: (b, t, 0)),
            pl.BlockSpec((Kp, 4 * hid), lambda b, t: (0, 0)),
            pl.BlockSpec((1, 4 * hid), lambda b, t: (0, 0)),
            pl.BlockSpec((1, M, 4 * hid), lambda b, t: (b, t, 0)),
        ],
        out_specs=pl.BlockSpec((1, M, 4 * hid), lambda b, t: (b, t, 0)),
        out_shape=jax.ShapeDtypeStruct((B, H * W, 4 * hid), jnp.float32),
        compiler_params=pltpu.CompilerParams(
            dimension_semantics=("parallel", "parallel"),
            vmem_limit_bytes=vmem_limit),
        cost_estimate=cost,
    )(patches, w_folded, b2, c_rep)

    # Lane slab -> NHWC -> NCHW (wrapper-side layout plumbing only).
    out = out.reshape(B, H, W, 4 * hid)
    c_next = jnp.transpose(out[..., hid:2 * hid], (0, 3, 1, 2))
    h_next = jnp.transpose(out[..., 2 * hid:3 * hid], (0, 3, 1, 2))
    return h_next, c_next


def _reference(input_nchw, h_cur, c_cur, weight_oihw, bias):
    """Pure-JAX f32 reference matching the PyTorch forward (for validation)."""
    combined = jnp.concatenate([input_nchw, h_cur], axis=1)
    conv = jax.lax.conv_general_dilated(
        combined, weight_oihw, window_strides=(1, 1), padding="SAME",
        dimension_numbers=("NCHW", "OIHW", "NCHW"))
    conv = conv + bias.reshape(1, -1, 1, 1)
    cc_i, cc_f, cc_o, cc_g = jnp.split(conv, 4, axis=1)
    i = jax.nn.sigmoid(cc_i)
    f = jax.nn.sigmoid(cc_f)
    o = jax.nn.sigmoid(cc_o)
    g = jnp.tanh(cc_g)
    c_next = f * c_cur + i * g
    h_next = o * jnp.tanh(c_next)
    return h_next, c_next


if __name__ == "__main__":
    batch = 2
    input_dim = 4
    hidden_dim = 32
    height = width = 16
    kernel_size = (3, 3)

    key = jax.random.PRNGKey(0)
    kx, kh, kc, kw_, kb = jax.random.split(key, 5)

    x = jax.random.normal(kx, (batch, input_dim, height, width), jnp.float32)
    h_cur = jax.random.normal(kh, (batch, hidden_dim, height, width), jnp.float32)
    c_cur = jax.random.normal(kc, (batch, hidden_dim, height, width), jnp.float32)

    fan_in = (input_dim + hidden_dim) * kernel_size[0] * kernel_size[1]
    bound = 1.0 / jnp.sqrt(fan_in)
    weight = jax.random.uniform(
        kw_, (4 * hidden_dim, input_dim + hidden_dim, *kernel_size),
        jnp.float32, -bound, bound)
    bias = jax.random.uniform(kb, (4 * hidden_dim,), jnp.float32, -bound, bound)

    fwd = jax.jit(functools.partial(conv_lstm_cell, kernel_size=kernel_size))
    h_next, c_next = fwd(x, h_cur, c_cur, weight, bias)
    jax.block_until_ready((h_next, c_next))

    # Validate against the f32 reference (bf16 matmul inputs -> loose tol).
    h_ref, c_ref = _reference(x, h_cur, c_cur, weight, bias)
    assert jnp.allclose(h_next, h_ref, atol=2e-2, rtol=2e-2), "h_next mismatch"
    assert jnp.allclose(c_next, c_ref, atol=2e-2, rtol=2e-2), "c_next mismatch"

    print("KERNEL_OK")
</pallas_src>

<mosaic_0001>
module attributes {stable_mosaic.version = 11 : i64} {
  func.func @_convlstm_kernel(%arg0: i32, %arg1: i32, %arg2: memref<1x256x384xbf16, #tpu.memory_space<vmem>>, %arg3: memref<384x128xbf16, #tpu.memory_space<vmem>>, %arg4: memref<1x128xf32, #tpu.memory_space<vmem>>, %arg5: memref<1x256x128xf32, #tpu.memory_space<vmem>>, %arg6: memref<1x256x128xf32, #tpu.memory_space<vmem>>) attributes {dimension_semantics = [#tpu.dimension_semantics<parallel>, #tpu.dimension_semantics<parallel>], iteration_bounds = array<i64: 2, 1>, scalar_prefetch = 0 : i64, scratch_operands = 0 : i64, tpu.core_type = #tpu.core_type<tc>, window_params = [{transform_indices = @transform_0, window_bounds = array<i64: 1, 256, 384>}, {pipeline_mode = #tpu.pipeline_mode<synchronous>, transform_indices = @transform_1, window_bounds = array<i64: 384, 128>}, {pipeline_mode = #tpu.pipeline_mode<synchronous>, transform_indices = @transform_2, window_bounds = array<i64: 1, 128>}, {transform_indices = @transform_3, window_bounds = array<i64: 1, 256, 128>}, {transform_indices = @transform_4, window_bounds = array<i64: 1, 256, 128>}]} {
    %c0 = arith.constant 0 : index
    %c0_0 = arith.constant 0 : index
    %c0_1 = arith.constant 0 : index
    %0 = vector.load %arg2[%c0, %c0_0, %c0_1] : memref<1x256x384xbf16, #tpu.memory_space<vmem>>, vector<1x256x384xbf16>
    %1 = vector.shape_cast %0 : vector<1x256x384xbf16> to vector<256x384xbf16>
    %c0_2 = arith.constant 0 : index
    %c0_3 = arith.constant 0 : index
    %2 = vector.load %arg3[%c0_2, %c0_3] : memref<384x128xbf16, #tpu.memory_space<vmem>>, vector<384x128xbf16>
    %cst = arith.constant dense<0.000000e+00> : vector<256x128xf32>
    %3 = tpu.matmul %1, %2, %cst {dimension_numbers = #tpu.dot_dimension_numbers<[1], [0], [0], [1], [0, 0, 1, 1], [], []>} : vector<256x384xbf16>, vector<384x128xbf16>, vector<256x128xf32> -> vector<256x128xf32>
    %c0_4 = arith.constant 0 : index
    %c0_5 = arith.constant 0 : index
    %4 = vector.load %arg4[%c0_4, %c0_5] : memref<1x128xf32, #tpu.memory_space<vmem>>, vector<1x128xf32>
    %5 = vector.broadcast %4 : vector<1x128xf32> to vector<256x128xf32>
    %6 = arith.addf %3, %5 : vector<256x128xf32>
    %7 = tpu.iota {dimensions = array<i32: 1>} : vector<256x128xi32>
    %c96_i32 = arith.constant 96 : i32
    %8 = vector.broadcast %c96_i32 : i32 to vector<256x128xi32>
    %9 = arith.cmpi sge, %7, %8 : vector<256x128xi32>
    %10 = arith.addf %6, %6 : vector<256x128xf32>
    %11 = arith.select %9, %10, %6 : vector<256x128xi1>, vector<256x128xf32>
    %12 = arith.negf %11 : vector<256x128xf32>
    %13 = math.exp %12 : vector<256x128xf32>
    %cst_6 = arith.constant 1.000000e+00 : f32
    %14 = vector.broadcast %cst_6 : f32 to vector<256x128xf32>
    %15 = arith.addf %14, %13 : vector<256x128xf32>
    %16 = arith.divf %14, %15 : vector<256x128xf32>
    %17 = arith.addf %16, %16 : vector<256x128xf32>
    %cst_7 = arith.constant 1.000000e+00 : f32
    %18 = vector.broadcast %cst_7 : f32 to vector<256x128xf32>
    %19 = arith.subf %17, %18 : vector<256x128xf32>
    %20 = arith.select %9, %19, %16 : vector<256x128xi1>, vector<256x128xf32>
    %c0_8 = arith.constant 0 : index
    %c0_9 = arith.constant 0 : index
    %c0_10 = arith.constant 0 : index
    %21 = vector.load %arg5[%c0_8, %c0_9, %c0_10] : memref<1x256x128xf32, #tpu.memory_space<vmem>>, vector<1x256x128xf32>
    %22 = vector.shape_cast %21 : vector<1x256x128xf32> to vector<256x128xf32>
    %23 = vector.extract_strided_slice %20 {offsets = [0, 96], sizes = [256, 32], strides = [1, 1]} : vector<256x128xf32> to vector<256x32xf32>
    %24 = vector.extract_strided_slice %20 {offsets = [0, 0], sizes = [256, 96], strides = [1, 1]} : vector<256x128xf32> to vector<256x96xf32>
    %25 = tpu.concatenate %23, %24 in 1 : vector<256x32xf32>, vector<256x96xf32> -> vector<256x128xf32>
    %26 = arith.mulf %20, %25 : vector<256x128xf32>
    %27 = arith.mulf %20, %22 : vector<256x128xf32>
    %28 = vector.extract_strided_slice %26 {offsets = [0, 96], sizes = [256, 32], strides = [1, 1]} : vector<256x128xf32> to vector<256x32xf32>
    %29 = vector.extract_strided_slice %26 {offsets = [0, 0], sizes = [256, 96], strides = [1, 1]} : vector<256x128xf32> to vector<256x96xf32>
    %30 = tpu.concatenate %28, %29 in 1 : vector<256x32xf32>, vector<256x96xf32> -> vector<256x128xf32>
    %31 = arith.addf %27, %30 : vector<256x128xf32>
    %32 = math.tanh %31 : vector<256x128xf32>
    %33 = vector.extract_strided_slice %32 {offsets = [0, 96], sizes = [256, 32], strides = [1, 1]} : vector<256x128xf32> to vector<256x32xf32>
    %34 = vector.extract_strided_slice %32 {offsets = [0, 0], sizes = [256, 96], strides = [1, 1]} : vector<256x128xf32> to vector<256x96xf32>
    %35 = tpu.concatenate %33, %34 in 1 : vector<256x32xf32>, vector<256x96xf32> -> vector<256x128xf32>
    %36 = arith.mulf %20, %35 : vector<256x128xf32>
    %c32_i32 = arith.constant 32 : i32
    %37 = vector.broadcast %c32_i32 : i32 to vector<256x128xi32>
    %38 = arith.cmpi sge, %7, %37 : vector<256x128xi32>
    %c64_i32 = arith.constant 64 : i32
    %39 = vector.broadcast %c64_i32 : i32 to vector<256x128xi32>
    %40 = arith.cmpi slt, %7, %39 : vector<256x128xi32>
    %41 = arith.andi %38, %40 : vector<256x128xi1>
    %42 = arith.select %41, %31, %36 : vector<256x128xi1>, vector<256x128xf32>
    %c0_11 = arith.constant 0 : index
    %c0_12 = arith.constant 0 : index
    %c0_13 = arith.constant 0 : index
    %43 = vector.load %arg6[%c0_11, %c0_12, %c0_13] : memref<1x256x128xf32, #tpu.memory_space<vmem>>, vector<1x256x128xf32>
    %44 = vector.shape_cast %43 : vector<1x256x128xf32> to vector<256x128xf32>
    %45 = vector.shape_cast %42 : vector<256x128xf32> to vector<1x256x128xf32>
    tpu.vector_store %arg6[%c0_11, %c0_12, %c0_13], %45 {strides = array<i32>} : memref<1x256x128xf32, #tpu.memory_space<vmem>>, vector<1x256x128xf32>,
    return
  }
  func.func @transform_0(%arg0: i32, %arg1: i32) -> (i32, i32, i32) {
    %c0_i32 = arith.constant 0 : i32
    %c0_i32_0 = arith.constant 0 : i32
    return %arg0, %arg1, %c0_i32 : i32, i32, i32
  }
  func.func @transform_1(%arg0: i32, %arg1: i32) -> (i32, i32) {
    %c0_i32 = arith.constant 0 : i32
    %c0_i32_0 = arith.constant 0 : i32
    %c0_i32_1 = arith.constant 0 : i32
    return %c0_i32, %c0_i32_0 : i32, i32
  }
  func.func @transform_2(%arg0: i32, %arg1: i32) -> (i32, i32) {
    %c0_i32 = arith.constant 0 : i32
    %c0_i32_0 = arith.constant 0 : i32
    %c0_i32_1 = arith.constant 0 : i32
    return %c0_i32, %c0_i32_0 : i32, i32
  }
  func.func @transform_3(%arg0: i32, %arg1: i32) -> (i32, i32, i32) {
    %c0_i32 = arith.constant 0 : i32
    %c0_i32_0 = arith.constant 0 : i32
    return %arg0, %arg1, %c0_i32 : i32, i32, i32
  }
  func.func @transform_4(%arg0: i32, %arg1: i32) -> (i32, i32, i32) {
    %c0_i32 = arith.constant 0 : i32
    %c0_i32_0 = arith.constant 0 : i32
    return %arg0, %arg1, %c0_i32 : i32, i32, i32
  }
}

</mosaic_0001>

<bundles_post_ra>
// kernel: conv_lstm_cell.1
= control target key start
LH: loop header
LB: loop body
LE: loop exit
PB: predicated region body
PF: predicated region fallthrough
CT: control target
= control target key end

     0   :  { %s2931_s15 = smov 0   ;;  %s2933_s16 = smov 0   ;;  %s3961_s0 = inlined_call_operand.vmem [shape: bf16[2,256,384], index: 0, kind: input, shape index: {}]   ;;  %s3962_s1 = inlined_call_operand.vmem [shape: bf16[384,128], index: 1, kind: input, shape index: {}]   ;;  %s3963_s2 = inlined_call_operand.vmem [shape: f32[1,128], index: 2, kind: input, shape index: {}]   ;;  %s3964_s3 = inlined_call_operand.vmem [shape: f32[2,256,128], index: 3, kind: input, shape index: {}]   ;;  %s3965_s4 = inlined_call_operand.vmem [shape: f32[2,256,128], index: 4, kind: output, shape index: {}]  }
   0x1   :  { %s2935_s17 = smov 0  }
   0x2 LB: > { %s26_s18 = sadd.s32 1, %s2899_s16  ;;  %p2228_p0 = scmp.ge.s32.totalorder %s2903_s17, 1  ;;  %s2903_s17 = sphi %s2935_s17, %s14_s17   ;;  %s2899_s16 = sphi %s2933_s16, %s4002_s16   ;;  %s2895_s15 = sphi %s2931_s15, %s4001_s15  }
   0x3   : > { %p28_p1 = scmp.ge.s32.totalorder %s26_s18, 2  ;;  %p201_p2 = scmp.lt.s32.totalorder %s2903_s17, 3 }
   0x5   : > { %s4004_s18 = smov (%p28_p1, %s26_s18), 0  ;;  %p202_p3 = pnand %p2228_p0, %p201_p2 }
   0x7   : > { %205 = sbr.rel (%p202_p3) target bundleno = 777 (0x309), region = 36 }
   0xe   : > { %v2601_v0 = vld [vmem:[%s3962_s1 + $0x40] sm:$0xff]   ;;  %v2603_v2 = vld [vmem:[%s3962_s1 + $0x48] sm:$0xff]   ;;  %p246_p4 = scmp.lt.s32.totalorder %s2895_s15, 1  ;;  %v2605_v4 = vld [vmem:[%s3962_s1 + $0x50] sm:$0xff]   ;;  %s2905_s29 = smov 32  }
   0xf   : > { %v2602_v1 = vld [vmem:[%s3962_s1] sm:$0xff]   ;;  %2375 = vmatprep.subr.bf16.mxu0 %v2601_v0  ;;  %2559 = vmatprep.subr.bf16.mxu1 %v2601_v0  ;;  %v2604_v3 = vld [vmem:[%s3962_s1 + $0x8] sm:$0xff]   ;;  %v2606_v5 = vld [vmem:[%s3962_s1 + $0x10] sm:$0xff]  }
  0x10   : > { %2376 = vmatpush3.bf16.msra.mxu0 %v2602_v1  ;;  %2567 = vmatpush3.bf16.msra.mxu1 %v2602_v1  ;;  %s4006_s15 = smov (!%p246_p4, %s2895_s15), 1  ;;  %v2607_v6 = vld [vmem:[%s3962_s1 + $0x58] sm:$0xff]   ;;  %v2609_v8 = vld [vmem:[%s3962_s1 + $0x60] sm:$0xff]   ;;  %v2611_v10 = vld [vmem:[%s3962_s1 + $0x68] sm:$0xff]  }
  0x11   : > { %2377 = vmatprep.subr.bf16.mxu0 %v2603_v2  ;;  %2560 = vmatprep.subr.bf16.mxu1 %v2603_v2  ;;  %s2575_s7 = smul.u32 384, %s4006_s15  ;;  %v2608_v7 = vld [vmem:[%s3962_s1 + $0x18] sm:$0xff]   ;;  %v2610_v9 = vld [vmem:[%s3962_s1 + $0x20] sm:$0xff]   ;;  %v2612_v13 = vld [vmem:[%s3962_s1 + $0x28] sm:$0xff]   ;;  %s2373_s30 = sshll.u32 %s4006_s15, 8 }
  0x12   : > { %v2613_v14 = vld [vmem:[%s3962_s1 + $0x70] sm:$0xff]   ;;  %v2615_v16 = vld [vmem:[%s3962_s1 + $0x78] sm:$0xff]   ;;  %v2623_v18 = vld [vmem:[%s3962_s1 + $0x80] sm:$0xff]   ;;  %s3790_s10 = scalar_lea.vmem %s3965_s4, %s2373_s30 }
  0x13   : > { %s2982_s14 = scalar_lea.vmem %s3961_s0, %s2575_s7  ;;  %v2614_v15 = vld [vmem:[%s3962_s1 + $0x30] sm:$0xff]   ;;  %v2616_v17 = vld [vmem:[%s3962_s1 + $0x38] sm:$0xff]   ;;  %v2624_v22 = vld [vmem:[%s3962_s1 + $0x88] sm:$0xff]   ;;  %s3585_s7 = scalar_lea.vmem %s3964_s3, %s2373_s30 }
  0x14   : > { %2378 = vmatpush3.bf16.msra.mxu0 %v2604_v3  ;;  %2568 = vmatpush3.bf16.msra.mxu1 %v2604_v3  ;;  %v2619_v11 = vld [vmem:[%s2982_s14 + $0x4] ss:$12 sps:$4 sm:$0xff]   ;;  %v2617_v19 = vld [vmem:[%s2982_s14] ss:$12 sps:$4 sm:$0xff]   ;;  %v2625_v21 = vld [vmem:[%s2982_s14 + $0x1c] ss:$12 sps:$4 sm:$0xff]  }
  0x15   : > { %2379 = vmatprep.subr.bf16.mxu0 %v2605_v4  ;;  %2561 = vmatprep.subr.bf16.mxu1 %v2605_v4  ;;  %v2622_v12 = vld [vmem:[%s2982_s14 + $0x124] ss:$12 sps:$4 sm:$0xff]   ;;  %v2620_v20 = vld [vmem:[%s2982_s14 + $0x120] ss:$12 sps:$4 sm:$0xff]   ;;  %v2627_v23 = vld [vmem:[%s2982_s14 + $0x13c] ss:$12 sps:$4 sm:$0xff]  }
  0x16   : > { %828 = vmatprep.mubr.bf16.mxu0 %v2619_v11  ;;  %924 = vmatprep.mubr.bf16.mxu1 %v2622_v12  ;;  %v2629_v24 = vld [vmem:[%s2982_s14 + $0x18] ss:$12 sps:$4 sm:$0xff]   ;;  %v2631_v25 = vld [vmem:[%s3962_s1 + $0x90] sm:$0xff]   ;;  %v2640_v33 = vld [vmem:[%s3962_s1 + $0xa8] sm:$0xff]  }
  0x17   : > { %v2630_v26 = vld [vmem:[%s2982_s14 + $0x138] ss:$12 sps:$4 sm:$0xff]   ;;  %v2633_v28 = vld [vmem:[%s2982_s14 + $0x34] ss:$12 sps:$4 sm:$0xff]   ;;  %v2637_v31 = vld [vmem:[%s2982_s14 + $0x30] ss:$12 sps:$4 sm:$0xff]  }
  0x18   : > { %2380 = vmatpush3.bf16.msra.mxu0 %v2606_v5  ;;  %2569 = vmatpush3.bf16.msra.mxu1 %v2606_v5  ;;  %v2632_v27 = vld [vmem:[%s3962_s1 + $0x98] sm:$0xff]   ;;  %v2635_v29 = vld [vmem:[%s2982_s14 + $0x154] ss:$12 sps:$4 sm:$0xff]   ;;  %v2649_v39 = vld [vmem:[%s2982_s14 + $0x64] ss:$12 sps:$4 sm:$0xff]  }
  0x19   : > { %2381 = vmatprep.subr.bf16.mxu0 %v2607_v6  ;;  %2562 = vmatprep.subr.bf16.mxu1 %v2607_v6  ;;  %v2639_v30 = vld [vmem:[%s3962_s1 + $0xa0] sm:$0xff]   ;;  %v2638_v32 = vld [vmem:[%s2982_s14 + $0x150] ss:$12 sps:$4 sm:$0xff]   ;;  %v2641_v34 = vld [vmem:[%s2982_s14 + $0x4c] ss:$12 sps:$4 sm:$0xff]  }
  0x1a   : > { %v2643_v35 = vld [vmem:[%s2982_s14 + $0x16c] ss:$12 sps:$4 sm:$0xff]   ;;  %v2647_v36 = vld [vmem:[%s3962_s1 + $0xb0] sm:$0xff]   ;;  %v2654_v44 = vld [vmem:[%s2982_s14 + $0x7c] ss:$12 sps:$4 sm:$0xff]  }
  0x1b   : > { %v2645_v37 = vld [vmem:[%s2982_s14 + $0x48] ss:$12 sps:$4 sm:$0xff]   ;;  %v2648_v40 = vld [vmem:[%s3962_s1 + $0xb8] sm:$0xff]   ;;  %v2652_v42 = vld [vmem:[%s2982_s14 + $0x60] ss:$12 sps:$4 sm:$0xff]  }
  0x1c   : > { %2382 = vmatpush3.bf16.msra.mxu0 %v2608_v7  ;;  %2570 = vmatpush3.bf16.msra.mxu1 %v2608_v7  ;;  %v2646_v38 = vld [vmem:[%s2982_s14 + $0x168] ss:$12 sps:$4 sm:$0xff]   ;;  %v2653_v43 = vld [vmem:[%s2982_s14 + $0x20] ss:$12 sps:$4 sm:$0xff]   ;;  %v2656_v45 = vld [vmem:[%s2982_s14 + $0x38] ss:$12 sps:$4 sm:$0xff]  }
  0x1d   : > { %2383 = vmatprep.subr.bf16.mxu0 %v2609_v8  ;;  %2563 = vmatprep.subr.bf16.mxu1 %v2609_v8  ;;  %v2651_v41 = vld [vmem:[%s2982_s14 + $0x8] ss:$12 sps:$4 sm:$0xff]   ;;  %v2657_v46 = vld [vmem:[%s2982_s14 + $0x78] ss:$12 sps:$4 sm:$0xff]   ;;  %v2658_v47 = vld [vmem:[%s2982_s14 + $0x50] ss:$12 sps:$4 sm:$0xff]  }
  0x1e   : > { %v2659_v48 = vld [vmem:[%s2982_s14 + $0x94] ss:$12 sps:$4 sm:$0xff]   ;;  %v2662_v50 = vld [vmem:[%s2982_s14 + $0x90] ss:$12 sps:$4 sm:$0xff]   ;;  %v2664_v52 = vld [vmem:[%s2982_s14 + $0xac] ss:$12 sps:$4 sm:$0xff]  }
  0x1f   : > { %v2661_v49 = vld [vmem:[%s2982_s14 + $0x68] ss:$12 sps:$4 sm:$0xff]   ;;  %v2663_v51 = vld [vmem:[%s2982_s14 + $0x80] ss:$12 sps:$4 sm:$0xff]   ;;  %v2666_v53 = vld [vmem:[%s2982_s14 + $0x98] ss:$12 sps:$4 sm:$0xff]  }
  0x20   : > { %2384 = vmatpush3.bf16.msra.mxu0 %v2610_v9  ;;  %2571 = vmatpush3.bf16.msra.mxu1 %v2610_v9  ;;  %v2667_v54 = vld [vmem:[%s2982_s14 + $0xa8] ss:$12 sps:$4 sm:$0xff]   ;;  %v2668_v55 = vld [vmem:[%s2982_s14 + $0xb0] ss:$12 sps:$4 sm:$0xff]   ;;  %v2672_v58 = vld [vmem:[%s2982_s14 + $0xc0] ss:$12 sps:$4 sm:$0xff]  }
  0x21   : > { %2385 = vmatprep.subr.bf16.mxu0 %v2611_v10  ;;  %2564 = vmatprep.subr.bf16.mxu1 %v2611_v10  ;;  %v2669_v56 = vld [vmem:[%s2982_s14 + $0xc4] ss:$12 sps:$4 sm:$0xff]   ;;  %v2671_v57 = vld [vmem:[%s2982_s14 + $0xc8] ss:$12 sps:$4 sm:$0xff]   ;;  %v2673_v59 = vld [vmem:[%s2982_s14 + $0xe0] ss:$12 sps:$4 sm:$0xff]  }
  0x22   : > { %v2674_v60 = vld [vmem:[%s2982_s14 + $0xdc] ss:$12 sps:$4 sm:$0xff]   ;;  %v2676_v61 = vld [vmem:[%s2982_s14 + $0xf8] ss:$12 sps:$4 sm:$0xff]   ;;  %v2679_v0 = vld [vmem:[%s2982_s14 + $0xf4] ss:$12 sps:$4 sm:$0xff]  }
  0x23   : > { %v2677_v62 = vld [vmem:[%s2982_s14 + $0xd8] ss:$12 sps:$4 sm:$0xff]   ;;  %v2678_v63 = vld [vmem:[%s2982_s14 + $0x110] ss:$12 sps:$4 sm:$0xff]   ;;  %v2681_v1 = vld [vmem:[%s2982_s14 + $0x128] ss:$12 sps:$4 sm:$0xff]  }
  0x24   : > { %2386 = vmatpush3.bf16.msra.mxu0 %v2612_v13  ;;  %2572 = vmatpush3.bf16.msra.mxu1 %v2612_v13  ;;  %v2682_v2 = vld [vmem:[%s2982_s14 + $0xf0] ss:$12 sps:$4 sm:$0xff]   ;;  %v2683_v3 = vld [vmem:[%s2982_s14 + $0x140] ss:$12 sps:$4 sm:$0xff]   ;;  %v2686_v5 = vld [vmem:[%s2982_s14 + $0x158] ss:$12 sps:$4 sm:$0xff]  }
  0x25   : > { %2387 = vmatprep.subr.bf16.mxu0 %v2613_v14  ;;  %2565 = vmatprep.subr.bf16.mxu1 %v2613_v14  ;;  %v2684_v4 = vld [vmem:[%s2982_s14 + $0x10c] ss:$12 sps:$4 sm:$0xff]   ;;  %v2687_v6 = vld [vmem:[%s2982_s14 + $0x108] ss:$12 sps:$4 sm:$0xff]   ;;  %v2688_v7 = vld [vmem:[%s2982_s14 + $0x170] ss:$12 sps:$4 sm:$0xff]  }
  0x28   : > { %2388 = vmatpush3.bf16.msra.mxu0 %v2614_v15  ;;  %2573 = vmatpush3.bf16.msra.mxu1 %v2614_v15 }
  0x29   : > { %2389 = vmatprep.subr.bf16.mxu0 %v2615_v16  ;;  %2566 = vmatprep.subr.bf16.mxu1 %v2615_v16 }
  0x2c   : > { %2390 = vmatpush3.bf16.msra.mxu0 %v2616_v17  ;;  %2574 = vmatpush3.bf16.msra.mxu1 %v2616_v17 }
  0x2d   : > { %2511 = vmatprep.subr.bf16.mxu1 %v2623_v18 }
  0x2f   : > { %829 = vmatmul.mubr.bf16.vlgmr.msra.gmra.mrb[0].mxu0 %v2617_v19  ;;  %925 = vmatmul.mubr.bf16.vlgmr.msra.gmra.mrb[0].mxu1 %v2620_v20 }
  0x30   : > { %2512 = vmatpush3.bf16.msra.mxu1 %v2623_v18  ;;  %836 = vmatprep.mubr.bf16.mxu0 %v2625_v21 }
  0x31   : > { %2513 = vmatprep.subr.bf16.mxu1 %v2624_v22  ;;  %932 = vmatprep.mubr.bf16.mxu1 %v2627_v23 }
  0x34   : > { %2514 = vmatpush3.bf16.msra.mxu1 %v2624_v22 }
  0x35   : > { %2515 = vmatprep.subr.bf16.mxu1 %v2631_v25 }
  0x37   : > { %837 = vmatmul.mubr.bf16.gmra.mrb[4].mxu0 %v2629_v24  ;;  %933 = vmatmul.mubr.bf16.gmra.mrb[4].mxu1 %v2630_v26 }
  0x38   : > { %2516 = vmatpush3.bf16.msra.mxu1 %v2631_v25  ;;  %844 = vmatprep.mubr.bf16.mxu0 %v2633_v28 }
  0x39   : > { %2517 = vmatprep.subr.bf16.mxu1 %v2632_v27  ;;  %940 = vmatprep.mubr.bf16.mxu1 %v2635_v29 }
  0x3c   : > { %2518 = vmatpush3.bf16.msra.mxu1 %v2632_v27 }
  0x3d   : > { %2519 = vmatprep.subr.bf16.mxu1 %v2639_v30 }
  0x3f   : > { %845 = vmatmul.mubr.bf16.gmra.mrb[8].mxu0 %v2637_v31  ;;  %941 = vmatmul.mubr.bf16.gmra.mrb[8].mxu1 %v2638_v32 }
  0x40   : > { %2520 = vmatpush3.bf16.msra.mxu1 %v2639_v30  ;;  %852 = vmatprep.mubr.bf16.mxu0 %v2641_v34 }
  0x41   : > { %2521 = vmatprep.subr.bf16.mxu1 %v2640_v33  ;;  %948 = vmatprep.mubr.bf16.mxu1 %v2643_v35 }
  0x44   : > { %2522 = vmatpush3.bf16.msra.mxu1 %v2640_v33 }
  0x45   : > { %2523 = vmatprep.subr.bf16.mxu1 %v2647_v36 }
  0x47   : > { %853 = vmatmul.mubr.bf16.gmra.mrb[12].mxu0 %v2645_v37  ;;  %949 = vmatmul.mubr.bf16.gmra.mrb[12].mxu1 %v2646_v38 }
  0x48   : > { %2524 = vmatpush3.bf16.msra.mxu1 %v2647_v36  ;;  %860 = vmatprep.mubr.bf16.mxu0 %v2649_v39 }
  0x49   : > { %2525 = vmatprep.subr.bf16.mxu1 %v2648_v40  ;;  %2527 = vmatprep.mubr.bf16.mxu1 %v2651_v41 }
  0x4c   : > { %2526 = vmatpush3.bf16.msra.mxu1 %v2648_v40 }
  0x4f   : > { %861 = vmatmul.mubr.bf16.gmra.mrb[16].mxu0 %v2652_v42  ;;  %2528 = vmatmul.mubr.bf16.vlgmr.msra.gmra.mrb[16].mxu1 %v2653_v43 }
  0x50   : > { %868 = vmatprep.mubr.bf16.mxu0 %v2654_v44  ;;  %2531 = vmatprep.mubr.bf16.mxu1 %v2656_v45 }
  0x57   : > { %869 = vmatmul.mubr.bf16.gmra.mrb[20].mxu0 %v2657_v46  ;;  %2532 = vmatmul.mubr.bf16.gmra.mrb[20].mxu1 %v2658_v47 }
  0x58   : > { %876 = vmatprep.mubr.bf16.mxu0 %v2659_v48  ;;  %2535 = vmatprep.mubr.bf16.mxu1 %v2661_v49 }
  0x5f   : > { %877 = vmatmul.mubr.bf16.gmra.mrb[24].mxu0 %v2662_v50  ;;  %2536 = vmatmul.mubr.bf16.gmra.mrb[24].mxu1 %v2663_v51 }
  0x60   : > { %884 = vmatprep.mubr.bf16.mxu0 %v2664_v52  ;;  %2539 = vmatprep.mubr.bf16.mxu1 %v2666_v53  ;;  %v1118_v52 = vlaneseq }
  0x67   : > { %885 = vmatmul.mubr.bf16.gmra.mrb[28].mxu0 %v2667_v54  ;;  %2540 = vmatmul.mubr.bf16.gmra.mrb[28].mxu1 %v2668_v55 }
  0x68   : > { %892 = vmatprep.mubr.bf16.mxu0 %v2669_v56  ;;  %2543 = vmatprep.mubr.bf16.mxu1 %v2671_v57  ;;  %v3098_v57 = vld [vmem:[%s3963_s2] ss:$0 sm:$0xff] }
  0x6f   : > { %893 = vmatmul.mubr.bf16.gmra.mrb[32].mxu0 %v2672_v58  ;;  %2544 = vmatmul.mubr.bf16.gmra.mrb[32].mxu1 %v2673_v59  ;;  %v3100_v58 = vand.u32 127, %v1118_v52 }
  0x70   : > { %900 = vmatprep.mubr.bf16.mxu0 %v2674_v60  ;;  %2547 = vmatprep.mubr.bf16.mxu1 %v2676_v61 }
  0x71   : > { %vm1120_vm0 = vcmp.ge.s32.totalorder %v3100_v58, 96  ;;  %vm2049_vm1 = vcmp.ge.s32.totalorder %v3100_v58, 32  ;;  %vm2050_vm2 = vcmp.lt.s32.totalorder %v3100_v58, 64 }
  0x72   : > { %vm3781_vm3 = vmand %vm2049_vm1, %vm2050_vm2 }
  0x77   : > { %901 = vmatmul.mubr.bf16.gmra.mrb[36].mxu0 %v2677_v62  ;;  %2548 = vmatmul.mubr.bf16.gmra.mrb[36].mxu1 %v2678_v63 }
  0x78   : > { %908 = vmatprep.mubr.bf16.mxu0 %v2679_v0  ;;  %2551 = vmatprep.mubr.bf16.mxu1 %v2681_v1 }
  0x7f   : > { %909 = vmatmul.mubr.bf16.gmra.mrb[40].mxu0 %v2682_v2  ;;  %2552 = vmatmul.mubr.bf16.gmra.mrb[40].mxu1 %v2683_v3 }
  0x80   : > { %916 = vmatprep.mubr.bf16.mxu0 %v2684_v4  ;;  %2555 = vmatprep.mubr.bf16.mxu1 %v2686_v5 }
  0x87   : > { %917 = vmatmul.mubr.bf16.gmra.mrb[44].mxu0 %v2687_v6  ;;  %2556 = vmatmul.mubr.bf16.gmra.mrb[44].mxu1 %v2688_v7 }
 0x102   : > { %v2391_v8 = vpop.f32.mrb[0].mxu0  ;;  %v2463_v9 = vpop.f32.mrb[0].mxu1 }
 0x103   : > { %v2392_v10 = vpop.f32.mrb[1].mxu0  ;;  %v2464_v11 = vpop.f32.mrb[1].mxu1 }
 0x104   : > { %v2393_v12 = vadd.f32 %v2392_v10, %v2391_v8  ;;  %v3077_v13 = vadd.f32 %v2464_v11, %v2463_v9  ;;  %v2394_v14 = vpop.f32.mrb[2].mxu0  ;;  %v2466_v15 = vpop.f32.mrb[2].mxu1 }
 0x105   : > { %v2395_v16 = vpop.f32.mrb[3].mxu0  ;;  %v2467_v17 = vpop.f32.mrb[3].mxu1 }
 0x106   : > { %v2396_v18 = vadd.f32 %v2395_v16, %v2394_v14  ;;  %v3079_v19 = vadd.f32 %v2467_v17, %v2466_v15  ;;  %v831_v62 = vadd.f32 %v2393_v12, %v3098_v57 }
 0x108   : > { %v834_v7 = vadd.f32 %v2396_v18, %v3098_v57 }
 0x10a   : > { %v2397_v20 = vpop.f32.mrb[4].mxu0  ;;  %v2469_v21 = vpop.f32.mrb[4].mxu1 }
 0x10b   : > { %v2398_v22 = vpop.f32.mrb[5].mxu0  ;;  %v2470_v23 = vpop.f32.mrb[5].mxu1 }
 0x10c   : > { %v2399_v24 = vadd.f32 %v2398_v22, %v2397_v20  ;;  %v3081_v25 = vadd.f32 %v2470_v23, %v2469_v21  ;;  %v2400_v26 = vpop.f32.mrb[6].mxu0  ;;  %v2472_v27 = vpop.f32.mrb[6].mxu1 }
 0x10d   : > { %v2401_v28 = vpop.f32.mrb[7].mxu0  ;;  %v2473_v29 = vpop.f32.mrb[7].mxu1 }
 0x10e   : > { %v2402_v30 = vadd.f32 %v2401_v28, %v2400_v26  ;;  %v3083_v31 = vadd.f32 %v2473_v29, %v2472_v27  ;;  %v839_v59 = vadd.f32 %v2399_v24, %v3098_v57 }
 0x110   : > { %v842_v2 = vadd.f32 %v2402_v30, %v3098_v57 }
 0x112   : > { %v2403_v32 = vpop.f32.mrb[8].mxu0  ;;  %v2475_v33 = vpop.f32.mrb[8].mxu1 }
 0x113   : > { %v2404_v34 = vpop.f32.mrb[9].mxu0  ;;  %v2476_v35 = vpop.f32.mrb[9].mxu1 }
 0x114   : > { %v2405_v36 = vadd.f32 %v2404_v34, %v2403_v32  ;;  %v3085_v37 = vadd.f32 %v2476_v35, %v2475_v33  ;;  %v2406_v38 = vpop.f32.mrb[10].mxu0  ;;  %v2478_v39 = vpop.f32.mrb[10].mxu1 }
 0x115   : > { %v2407_v40 = vpop.f32.mrb[11].mxu0  ;;  %v2479_v41 = vpop.f32.mrb[11].mxu1 }
 0x116   : > { %v3087_v42 = vadd.f32 %v2407_v40, %v2406_v38  ;;  %v3089_v43 = vadd.f32 %v2479_v41, %v2478_v39  ;;  %v847_v30 = vadd.f32 %v2405_v36, %v3098_v57 }
 0x11a   : > { %v2409_v44 = vpop.f32.mrb[12].mxu0  ;;  %v2481_v45 = vpop.f32.mrb[12].mxu1 }
 0x11b   : > { %v2410_v46 = vpop.f32.mrb[13].mxu0  ;;  %v2482_v47 = vpop.f32.mrb[13].mxu1 }
 0x11c   : > { %v2411_v48 = vadd.f32 %v2410_v46, %v2409_v44  ;;  %v3091_v49 = vadd.f32 %v2482_v47, %v2481_v45  ;;  %v2412_v50 = vpop.f32.mrb[14].mxu0  ;;  %v2484_v51 = vpop.f32.mrb[14].mxu1  ;;  %v850_v45 = vadd.f32 %v3087_v42, %v3098_v57  ;;  %v3128_v42 = vadd.f32 %v3077_v13, %v3098_v57 }
 0x11d   : > { %v2413_v53 = vpop.f32.mrb[15].mxu0  ;;  %v2485_v54 = vpop.f32.mrb[15].mxu1 }
 0x11e   : > { %v2414_v55 = vadd.f32 %v2413_v53, %v2412_v50  ;;  %v3093_v56 = vadd.f32 %v2485_v54, %v2484_v51  ;;  %v855_v24 = vadd.f32 %v2411_v48, %v3098_v57 }
 0x120   : > { %v858_v38 = vadd.f32 %v2414_v55, %v3098_v57 }
 0x122   : > { %v2415_v60 = vpop.f32.mrb[16].mxu0  ;;  %v2529_v61 = vpop.f32.mrb[16].mxu1 }
 0x123   : > { %v1000_v63 = vadd.f32 %v2529_v61, %v839_v59  ;;  %v2416_v0 = vpop.f32.mrb[17].mxu0  ;;  %v991_v1 = vpop.f32.mrb[17].mxu1 }
 0x124   : > { %v2417_v3 = vadd.f32 %v2416_v0, %v2415_v60  ;;  %v992_v4 = vadd.f32 %v991_v1, %v831_v62  ;;  %v2418_v5 = vpop.f32.mrb[18].mxu0  ;;  %v2530_v6 = vpop.f32.mrb[18].mxu1  ;;  %v3135_v0 = vadd.f32 %v3079_v19, %v3098_v57 }
 0x125   : > { %v1123_v8 = vadd.f32 %v1000_v63, %v1000_v63  ;;  %v1003_v9 = vadd.f32 %v2530_v6, %v842_v2  ;;  %v2419_v10 = vpop.f32.mrb[19].mxu0  ;;  %v994_v11 = vpop.f32.mrb[19].mxu1 }
 0x126   : > { %v1121_v14 = vadd.f32 %v992_v4, %v992_v4  ;;  %v3107_v15 = vadd.f32 %v2419_v10, %v2418_v5  ;;  %v995_v12 = vadd.f32 %v994_v11, %v834_v7  ;;  %v863_v13 = vadd.f32 %v2417_v3, %v3098_v57 }
 0x127   : > { %v1155_v16 = vsel %vm1120_vm0, %v1123_v8, %v1000_v63  ;;  %v1124_v17 = vadd.f32 %v1003_v9, %v1003_v9 }
 0x128   : > { %v2309_v20 = vmul.f32 -1.442695, %v1155_v16  ;;  %v1153_v21 = vsel %vm1120_vm0, %v1121_v14, %v992_v4  ;;  %v1122_v22 = vadd.f32 %v995_v12, %v995_v12 }
 0x129   : > { %v2307_v23 = vmul.f32 -1.442695, %v1153_v21  ;;  %v1156_v18 = vsel %vm1120_vm0, %v1124_v17, %v1003_v9  ;;  %v866_v17 = vadd.f32 %v3107_v15, %v3098_v57 }
 0x12a   : > { %2689 = vpow2.f32 %v2309_v20  ;;  %v2310_v26 = vmul.f32 -1.442695, %v1156_v18  ;;  %v1154_v27 = vsel %vm1120_vm0, %v1122_v22, %v995_v12  ;;  %v2421_v28 = vpop.f32.mrb[20].mxu0  ;;  %v2533_v29 = vpop.f32.mrb[20].mxu1 }
 0x12b   : > { %2691 = vpow2.f32 %v2307_v23  ;;  %v2308_v32 = vmul.f32 -1.442695, %v1154_v27  ;;  %v1016_v33 = vadd.f32 %v2533_v29, %v855_v24  ;;  %v2422_v34 = vpop.f32.mrb[21].mxu0  ;;  %v1007_v35 = vpop.f32.mrb[21].mxu1 }
 0x12c   : > { %2693 = vpow2.f32 %v2310_v26  ;;  %v2423_v39 = vadd.f32 %v2422_v34, %v2421_v28  ;;  %v1008_v40 = vadd.f32 %v1007_v35, %v847_v30  ;;  %v2424_v41 = vpop.f32.mrb[22].mxu0  ;;  %v2534_v44 = vpop.f32.mrb[22].mxu1 }
 0x12d   : > { %2695 = vpow2.f32 %v2308_v32  ;;  %v1127_v46 = vadd.f32 %v1016_v33, %v1016_v33  ;;  %v1019_v47 = vadd.f32 %v2534_v44, %v858_v38  ;;  %v2425_v48 = vpop.f32.mrb[23].mxu0  ;;  %v1010_v36 = vpop.f32.mrb[23].mxu1 }
 0x12e   : > { %v1125_v50 = vadd.f32 %v1008_v40, %v1008_v40  ;;  %v2426_v51 = vadd.f32 %v2425_v48, %v2424_v41  ;;  %v1011_v52 = vadd.f32 %v1010_v36, %v850_v45  ;;  %v871_v63 = vadd.f32 %v2423_v39, %v3098_v57 }
 0x12f   : > { %v1159_v53 = vsel %vm1120_vm0, %v1127_v46, %v1016_v33  ;;  %v1128_v54 = vadd.f32 %v1019_v47, %v1019_v47  ;;  %v3152_v48 = vadd.f32 %v3081_v25, %v3098_v57 }
 0x130   : > { %v2313_v55 = vmul.f32 -1.442695, %v1159_v53  ;;  %v1157_v59 = vsel %vm1120_vm0, %v1125_v50, %v1008_v40  ;;  %v1126_v60 = vadd.f32 %v1011_v52, %v1011_v52  ;;  %v874_v10 = vadd.f32 %v2426_v51, %v3098_v57 }
 0x131   : > { %v2311_v61 = vmul.f32 -1.442695, %v1157_v59  ;;  %v1160_v62 = vsel %vm1120_vm0, %v1128_v54, %v1019_v47  ;;  %v3162_v53 = vadd.f32 %v3085_v37, %v3098_v57 }
 0x132   : > { %2697 = vpow2.f32 %v2313_v55  ;;  %v2314_v1 = vmul.f32 -1.442695, %v1160_v62  ;;  %v1158_v2 = vsel %vm1120_vm0, %v1126_v60, %v1011_v52  ;;  %v2427_v4 = vpop.f32.mrb[24].mxu0  ;;  %v2537_v5 = vpop.f32.mrb[24].mxu1  ;;  %v3158_v52 = vadd.f32 %v3083_v31, %v3098_v57 }
 0x133   : > { %2699 = vpow2.f32 %v2311_v61  ;;  %v2312_v6 = vmul.f32 -1.442695, %v1158_v2  ;;  %v1032_v7 = vadd.f32 %v2537_v5, %v871_v63  ;;  %v2428_v8 = vpop.f32.mrb[25].mxu0  ;;  %v1023_v9 = vpop.f32.mrb[25].mxu1  ;;  %v3167_v31 = vadd.f32 %v3091_v49, %v3098_v57 }
 0x134   : > { %v2690_v11 = vpop.eup %2689  ;;  %2701 = vpow2.f32 %v2314_v1  ;;  %v2429_v19 = vadd.f32 %v2428_v8, %v2427_v4  ;;  %v1024_v14 = vadd.f32 %v1023_v9, %v863_v13  ;;  %v2430_v12 = vpop.f32.mrb[26].mxu0 }
 0x135   : > { %v2538_v16 = vpop.f32.mrb[26].mxu1  ;;  %v2692_v20 = vpop.eup %2691  ;;  %v1283_v21 = vadd.f32 1.0, %v2690_v11  ;;  %2703 = vpow2.f32 %v2312_v6  ;;  %v1131_v3 = vadd.f32 %v1032_v7, %v1032_v7 }
 0x136   : > { %v1035_v22 = vadd.f32 %v2538_v16, %v874_v10  ;;  %v2431_v23 = vpop.f32.mrb[27].mxu0  ;;  %v1026_v18 = vpop.f32.mrb[27].mxu1  ;;  %v1281_v26 = vadd.f32 1.0, %v2692_v20  ;;  %v1129_v27 = vadd.f32 %v1024_v14, %v1024_v14  ;;  %v879_v47 = vadd.f32 %v2429_v19, %v3098_v57 }
 0x137   : > { %v2694_v24 = vpop.eup %2693  ;;  %v2432_v28 = vadd.f32 %v2431_v23, %v2430_v12  ;;  %v1027_v29 = vadd.f32 %v1026_v18, %v866_v17  ;;  %2705 = vrcp.f32 %v1283_v21  ;;  %v1163_v33 = vsel %vm1120_vm0, %v1131_v3, %v1032_v7 }
 0x138   : > { %v2696_v30 = vpop.eup %2695  ;;  %v1284_v32 = vadd.f32 1.0, %v2694_v24  ;;  %v1132_v34 = vadd.f32 %v1035_v22, %v1035_v22  ;;  %2707 = vrcp.f32 %v1281_v26  ;;  %v2317_v35 = vmul.f32 -1.442695, %v1163_v33 }
 0x139   : > { %v1282_v15 = vadd.f32 1.0, %v2696_v30  ;;  %v1161_v38 = vsel %vm1120_vm0, %v1129_v27, %v1024_v14  ;;  %v1130_v41 = vadd.f32 %v1027_v29, %v1027_v29  ;;  %v882_v2 = vadd.f32 %v2432_v28, %v3098_v57 }
 0x13a   : > { %2709 = vrcp.f32 %v1284_v32  ;;  %v2315_v39 = vmul.f32 -1.442695, %v1161_v38  ;;  %v1164_v40 = vsel %vm1120_vm0, %v1132_v34, %v1035_v22  ;;  %v2433_v45 = vpop.f32.mrb[28].mxu0  ;;  %v2541_v46 = vpop.f32.mrb[28].mxu1  ;;  %v3177_v18 = vadd.f32 %v3093_v56, %v3098_v57 }
 0x13b   : > { %2711 = vrcp.f32 %v1282_v15  ;;  %v2318_v44 = vmul.f32 -1.442695, %v1164_v40  ;;  %v1162_v36 = vsel %vm1120_vm0, %v1130_v41, %v1027_v29  ;;  %v2434_v50 = vpop.f32.mrb[29].mxu0  ;;  %v1039_v51 = vpop.f32.mrb[29].mxu1 }
 0x13c   : > { %2713 = vpow2.f32 %v2317_v35  ;;  %v2698_v54 = vpop.eup %2697  ;;  %v2316_v55 = vmul.f32 -1.442695, %v1162_v36  ;;  %v2435_v59 = vadd.f32 %v2434_v50, %v2433_v45  ;;  %v1040_v25 = vadd.f32 %v1039_v51, %v879_v47  ;;  %v2436_v60 = vpop.f32.mrb[30].mxu0 }
 0x13d   : > { %2715 = vpow2.f32 %v2315_v39  ;;  %v2542_v61 = vpop.f32.mrb[30].mxu1  ;;  %v2700_v62 = vpop.eup %2699  ;;  %v1287_v63 = vadd.f32 1.0, %v2698_v54 }
 0x13e   : > { %2717 = vpow2.f32 %v2318_v44  ;;  %v2437_v1 = vpop.f32.mrb[31].mxu0  ;;  %v1042_v4 = vpop.f32.mrb[31].mxu1  ;;  %v1285_v5 = vadd.f32 1.0, %v2700_v62  ;;  %v887_v13 = vadd.f32 %v2435_v59, %v3098_v57  ;;  %v1133_v6 = vadd.f32 %v1040_v25, %v1040_v25 }
 0x13f   : > { %v2702_v37 = vpop.eup %2701  ;;  %2719 = vpow2.f32 %v2316_v55  ;;  %v2438_v9 = vadd.f32 %v2437_v1, %v2436_v60  ;;  %v1043_v10 = vadd.f32 %v1042_v4, %v882_v2 }
 0x140   : > { %v2704_v7 = vpop.eup %2703  ;;  %2721 = vrcp.f32 %v1287_v63  ;;  %v1288_v8 = vadd.f32 1.0, %v2702_v37  ;;  %v1048_v19 = vadd.f32 %v2541_v46, %v887_v13  ;;  %v1165_v14 = vsel %vm1120_vm0, %v1133_v6, %v1040_v25 }
 0x141   : > { %2723 = vrcp.f32 %v1285_v5  ;;  %v1286_v11 = vadd.f32 1.0, %v2704_v7  ;;  %v2706_v12 = vpop.eup %2705  ;;  %v2319_v49 = vmul.f32 -1.442695, %v1165_v14  ;;  %v890_v16 = vadd.f32 %v2438_v9, %v3098_v57 }
 0x142   : > { %2725 = vrcp.f32 %v1288_v8  ;;  %v1134_v17 = vadd.f32 %v1043_v10, %v1043_v10  ;;  %v2708_v20 = vpop.eup %2707  ;;  %v1135_v21 = vadd.f32 %v1048_v19, %v1048_v19  ;;  %v2439_v3 = vpop.f32.mrb[32].mxu0  ;;  %v1379_v23 = vadd.f32 %v2706_v12, %v2706_v12 }
 0x143   : > { %2727 = vrcp.f32 %v1286_v11  ;;  %v3173_v22 = vpop.f32.mrb[32].mxu1  ;;  %v1051_v26 = vadd.f32 %v2542_v61, %v890_v16  ;;  %v2440_v28 = vpop.f32.mrb[33].mxu0  ;;  %v1377_v30 = vadd.f32 %v2708_v20, %v2708_v20 }
 0x144   : > { %v3179_v24 = vpop.eup %2709  ;;  %2729 = vpow2.f32 %v2319_v49  ;;  %v1166_v27 = vsel %vm1120_vm0, %v1134_v17, %v1043_v10  ;;  %v1055_v29 = vpop.f32.mrb[33].mxu1  ;;  %v1167_v33 = vsel %vm1120_vm0, %v1135_v21, %v1048_v19  ;;  %v2441_v15 = vadd.f32 %v2440_v28, %v2439_v3 }
 0x145   : > { %v3183_v32 = vpop.eup %2711  ;;  %v2320_v34 = vmul.f32 -1.442695, %v1166_v27  ;;  %v2442_v35 = vpop.f32.mrb[34].mxu0  ;;  %v2341_v38 = vadd.f32 -1.0, %v1379_v23  ;;  %v2321_v40 = vmul.f32 -1.442695, %v1167_v33  ;;  %v1136_v41 = vadd.f32 %v1051_v26, %v1051_v26 }
 0x146   : > { %v3187_v56 = vpop.f32.mrb[34].mxu1  ;;  %v2714_v39 = vpop.eup %2713  ;;  %v2339_v46 = vadd.f32 -1.0, %v1377_v30  ;;  %v1380_v47 = vadd.f32 %v3179_v24, %v3179_v24  ;;  %v895_v51 = vadd.f32 %v2441_v15, %v3098_v57  ;;  %v1378_v10 = vadd.f32 %v3183_v32, %v3183_v32 }
 0x147   : > { %v2443_v44 = vpop.f32.mrb[35].mxu0  ;;  %v1058_v45 = vpop.f32.mrb[35].mxu1  ;;  %v1291_v50 = vadd.f32 1.0, %v2714_v39  ;;  %2731 = vpow2.f32 %v2320_v34  ;;  %v1168_v25 = vsel %vm1120_vm0, %v1136_v41, %v1051_v26  ;;  %v3196_v60 = vsel %vm1120_vm0, %v2341_v38, %v2706_v12 }
 0x148   : > { %v2716_v36 = vpop.eup %2715  ;;  %v2444_v54 = vadd.f32 %v2443_v44, %v2442_v35  ;;  %2733 = vpow2.f32 %v2321_v40  ;;  %v2322_v63 = vmul.f32 -1.442695, %v1168_v25  ;;  %v1056_v1 = vadd.f32 %v1055_v29, %v895_v51  ;;  %1541 = vrot.lane.b32.xlu1 %v3196_v60, %s2905_s29 }
 0x149   : > { %v2718_v55 = vpop.eup %2717  ;;  %v1289_v59 = vadd.f32 1.0, %v2716_v36  ;;  %2735 = vrcp.f32 %v1291_v50  ;;  %v3203_v5 = vsel %vm1120_vm0, %v2339_v46, %v2708_v20  ;;  %v2342_v9 = vadd.f32 -1.0, %v1380_v47 }
 0x14a   : > { %v2720_v61 = vpop.eup %2719  ;;  %v1292_v62 = vadd.f32 1.0, %v2718_v55  ;;  %v898_v37 = vadd.f32 %v2444_v54, %v3098_v57  ;;  %v1137_v6 = vadd.f32 %v1056_v1, %v1056_v1  ;;  %1537 = vrot.lane.b32.xlu0 %v3203_v5, %s2905_s29  ;;  %v2445_v7 = vpop.f32.mrb[36].mxu0  ;;  %v2340_v30 = vadd.f32 -1.0, %v1378_v10 }
 0x14b   : > { %v2722_v2 = vpop.eup %2721  ;;  %2737 = vrcp.f32 %v1289_v59  ;;  %v1290_v4 = vadd.f32 1.0, %v2720_v61  ;;  %v3209_v8 = vpop.f32.mrb[36].mxu1  ;;  %v3224_v3 = vsel %vm1120_vm0, %v2342_v9, %v3179_v24 }
 0x14c   : > { %v3205_v13 = vpop.eup %2723  ;;  %2739 = vrcp.f32 %v1292_v62  ;;  %v1059_v19 = vadd.f32 %v1058_v45, %v898_v37  ;;  %v2446_v14 = vpop.f32.mrb[37].mxu0  ;;  %v1383_v49 = vadd.f32 %v2722_v2, %v2722_v2  ;;  %v1169_v20 = vsel %vm1120_vm0, %v1137_v6, %v1056_v1  ;;  %1543 = vrot.lane.b32.xlu1 %v3224_v3, %s2905_s29 }
 0x14d   : > { %v2726_v11 = vpop.eup %2725  ;;  %2741 = vrcp.f32 %v1290_v4  ;;  %v3213_v12 = vpop.f32.mrb[37].mxu1  ;;  %v1381_v16 = vadd.f32 %v3205_v13, %v3205_v13  ;;  %v2447_v21 = vadd.f32 %v2446_v14, %v2445_v7  ;;  %v2323_v28 = vmul.f32 -1.442695, %v1169_v20 }
 0x14e   : > { %v3217_v17 = vpop.eup %2727  ;;  %2743 = vpow2.f32 %v2322_v63  ;;  %v2448_v23 = vpop.f32.mrb[38].mxu0  ;;  %v1138_v29 = vadd.f32 %v1059_v19, %v1059_v19  ;;  %v2345_v15 = vadd.f32 -1.0, %v1383_v49  ;;  %v1384_v24 = vadd.f32 %v2726_v11, %v2726_v11 }
 0x14f   : > { %v3226_v26 = vpop.f32.mrb[38].mxu1  ;;  %v2730_v27 = vpop.eup %2729  ;;  %v903_v38 = vadd.f32 %v2447_v21, %v3098_v57  ;;  %2745 = vpow2.f32 %v2323_v28  ;;  %v3238_v41 = vsel %vm1120_vm0, %v2340_v30, %v3183_v32  ;;  %v2343_v55 = vadd.f32 -1.0, %v1381_v16 }
 0x150   : > { %v2449_v33 = vpop.f32.mrb[39].mxu0  ;;  %v3230_v34 = vpop.f32.mrb[39].mxu1  ;;  %v1293_v35 = vadd.f32 1.0, %v2730_v27  ;;  %v1170_v40 = vsel %vm1120_vm0, %v1138_v29, %v1059_v19  ;;  %v3242_v44 = vsel %vm1120_vm0, %v2345_v15, %v2722_v2  ;;  %1539 = vrot.lane.b32.xlu0 %v3238_v41, %s2905_s29  ;;  %v2346_v54 = vadd.f32 -1.0, %v1384_v24 }
 0x151   : > { %v2450_v39 = vadd.f32 %v2449_v33, %v2448_v23  ;;  %v2732_v45 = vpop.eup %2731  ;;  %v2324_v46 = vmul.f32 -1.442695, %v1170_v40  ;;  %v1064_v47 = vadd.f32 %v3173_v22, %v903_v38  ;;  %v1382_v32 = vadd.f32 %v3217_v17, %v3217_v17 }
 0x152   : > { %2747 = vrcp.f32 %v1293_v35  ;;  %v2734_v50 = vpop.eup %2733  ;;  %v1294_v51 = vadd.f32 1.0, %v2732_v45  ;;  %v2451_v22 = vpop.f32.mrb[40].mxu0  ;;  %v3257_v2 = vsel %vm1120_vm0, %v2346_v54, %v2726_v11  ;;  %v3263_v7 = vsel %vm1120_vm0, %v2343_v55, %v3205_v13 }
 0x153   : > { %v906_v36 = vadd.f32 %v2450_v39, %v3098_v57  ;;  %v3250_v59 = vpop.eup %2735  ;;  %v1295_v25 = vadd.f32 1.0, %v2734_v50  ;;  %2749 = vpow2.f32 %v2324_v46  ;;  %v1139_v61 = vadd.f32 %v1064_v47, %v1064_v47  ;;  %v2553_v63 = vpop.f32.mrb[40].mxu1  ;;  %1551 = vrot.lane.b32.xlu1 %v3257_v2, %s2905_s29 }
 0x154   : > { %2751 = vrcp.f32 %v1294_v51  ;;  %v1096_v4 = vadd.f32 %v2553_v63, %v3152_v48  ;;  %v2452_v37 = vpop.f32.mrb[41].mxu0  ;;  %v1087_v6 = vpop.f32.mrb[41].mxu1  ;;  %1549 = vrot.lane.b32.xlu0 %v3242_v44, %s2905_s29 }
 0x155   : > { %v1067_v62 = vadd.f32 %v3187_v56, %v906_v36  ;;  %v3253_v1 = vpop.eup %2737  ;;  %2753 = vrcp.f32 %v1295_v25  ;;  %v1171_v56 = vsel %vm1120_vm0, %v1139_v61, %v1064_v47  ;;  %v2453_v48 = vadd.f32 %v2452_v37, %v2451_v22  ;;  %v2454_v11 = vpop.f32.mrb[42].mxu0 }
 0x156   : > { %v3265_v9 = vpop.eup %2739  ;;  %v2554_v19 = vpop.f32.mrb[42].mxu1  ;;  %v2325_v13 = vmul.f32 -1.442695, %v1171_v56  ;;  %v1147_v49 = vadd.f32 %v1096_v4, %v1096_v4  ;;  %v1088_v16 = vadd.f32 %v1087_v6, %v3128_v42 }
 0x157   : > { %v1140_v10 = vadd.f32 %v1067_v62, %v1067_v62  ;;  %v3273_v14 = vpop.eup %2741  ;;  %v1099_v20 = vadd.f32 %v2554_v19, %v3158_v52  ;;  %v2455_v21 = vpop.f32.mrb[43].mxu0  ;;  %v911_v29 = vadd.f32 %v2453_v48, %v3098_v57 }
 0x158   : > { %v1090_v23 = vpop.f32.mrb[43].mxu1  ;;  %v2744_v27 = vpop.eup %2743  ;;  %v2456_v30 = vadd.f32 %v2455_v21, %v2454_v11  ;;  %2755 = vpow2.f32 %v2325_v13  ;;  %v1179_v38 = vsel %vm1120_vm0, %v1147_v49, %v1096_v4  ;;  %v1145_v39 = vadd.f32 %v1088_v16, %v1088_v16  ;;  %1545 = vrot.lane.b32.xlu0 %v3263_v7, %s2905_s29 }
 0x159   : > { %v1172_v28 = vsel %vm1120_vm0, %v1140_v10, %v1067_v62  ;;  %v1091_v33 = vadd.f32 %v1090_v23, %v3135_v0  ;;  %v1296_v15 = vadd.f32 1.0, %v2744_v27  ;;  %v2333_v42 = vmul.f32 -1.442695, %v1179_v38  ;;  %v2746_v40 = vpop.eup %2745 }
 0x15a   : > { %v2326_v35 = vmul.f32 -1.442695, %v1172_v28  ;;  %v1072_v52 = vadd.f32 %v3213_v12, %v911_v29  ;;  %v1148_v24 = vadd.f32 %v1099_v20, %v1099_v20  ;;  %v914_v45 = vadd.f32 %v2456_v30, %v3098_v57  ;;  %v2457_v12 = vpop.f32.mrb[44].mxu0  ;;  %v2557_v54 = vpop.f32.mrb[44].mxu1 }
 0x15b   : > { %2757 = vrcp.f32 %v1296_v15  ;;  %v1146_v46 = vadd.f32 %v1091_v33, %v1091_v33  ;;  %v2344_v0 = vadd.f32 -1.0, %v1382_v32  ;;  %v1297_v36 = vadd.f32 1.0, %v2746_v40  ;;  %v2458_v62 = vpop.f32.mrb[45].mxu0  ;;  %v1103_v22 = vpop.f32.mrb[45].mxu1 }
 0x15c   : > { %v3287_v47 = vpop.eup %2747  ;;  %2759 = vpow2.f32 %v2326_v35  ;;  %v1141_v50 = vadd.f32 %v1072_v52, %v1072_v52  ;;  %v1177_v51 = vsel %vm1120_vm0, %v1145_v39, %v1088_v16  ;;  %v1180_v25 = vsel %vm1120_vm0, %v1148_v24, %v1099_v20  ;;  %v2460_v6 = vpop.f32.mrb[46].mxu0 }
 0x15d   : > { %2761 = vpow2.f32 %v2333_v42  ;;  %v2331_v55 = vmul.f32 -1.442695, %v1177_v51  ;;  %v1075_v61 = vadd.f32 %v3230_v34, %v914_v45  ;;  %v2750_v32 = vpop.eup %2749  ;;  %v2334_v4 = vmul.f32 -1.442695, %v1180_v25  ;;  %v2558_v56 = vpop.f32.mrb[46].mxu1 }
 0x15e   : > { %2763 = vrcp.f32 %v1297_v36  ;;  %v1173_v63 = vsel %vm1120_vm0, %v1141_v50, %v1072_v52  ;;  %v1178_v37 = vsel %vm1120_vm0, %v1146_v46, %v1091_v33  ;;  %v3298_v10 = vpop.eup %2751  ;;  %v1298_v48 = vadd.f32 1.0, %v2750_v32  ;;  %v2461_v34 = vpop.f32.mrb[47].mxu0 }
 0x15f   : > { %v2327_v11 = vmul.f32 -1.442695, %v1173_v63  ;;  %2765 = vpow2.f32 %v2331_v55  ;;  %v1142_v19 = vadd.f32 %v1075_v61, %v1075_v61  ;;  %v3300_v13 = vpop.f32.mrb[47].mxu1  ;;  %v3302_v49 = vpop.eup %2753  ;;  %v2332_v16 = vmul.f32 -1.442695, %v1178_v37 }
 0x160   : > { %2767 = vpow2.f32 %v2334_v4  ;;  %v3307_v20 = vsel %vm1120_vm0, %v2344_v0, %v3217_v17  ;;  %v1387_v21 = vadd.f32 %v3250_v59, %v3250_v59  ;;  %v1388_v27 = vadd.f32 %v3265_v9, %v3265_v9 }
 0x161   : > { %2769 = vrcp.f32 %v1298_v48  ;;  %v1174_v23 = vsel %vm1120_vm0, %v1142_v19, %v1075_v61  ;;  %1547 = vrot.lane.b32.xlu1 %v3307_v20, %s2905_s29  ;;  %v1112_v28 = vadd.f32 %v2557_v54, %v3167_v31  ;;  %v2459_v17 = vadd.f32 %v2458_v62, %v2457_v12 }
 0x162   : > { %2771 = vpow2.f32 %v2327_v11  ;;  %v2328_v29 = vmul.f32 -1.442695, %v1174_v23  ;;  %v2349_v30 = vadd.f32 -1.0, %v1387_v21  ;;  %v2756_v33 = vpop.eup %2755  ;;  %v2350_v15 = vadd.f32 -1.0, %v1388_v27 }
 0x163   : > { %2773 = vpow2.f32 %v2332_v16  ;;  %v1151_v35 = vadd.f32 %v1112_v28, %v1112_v28  ;;  %v1104_v38 = vadd.f32 %v1103_v22, %v3162_v53  ;;  %v1299_v42 = vadd.f32 1.0, %v2756_v33 }
 0x164   : > { %2775 = vpow2.f32 %v2328_v29  ;;  %v3322_v52 = vsel %vm1120_vm0, %v2349_v30, %v3250_v59  ;;  %v919_v39 = vadd.f32 %v2459_v17, %v3098_v57  ;;  %v3332_v24 = vsel %vm1120_vm0, %v2350_v15, %v3265_v9 }
 0x165   : > { %v3325_v31 = vpop.eup %2757  ;;  %1557 = vrot.lane.b32.xlu0 %v3322_v52, %s2905_s29  ;;  %v1183_v53 = vsel %vm1120_vm0, %v1151_v35, %v1112_v28  ;;  %v1149_v40 = vadd.f32 %v1104_v38, %v1104_v38  ;;  %v1115_v45 = vadd.f32 %v2558_v56, %v3177_v18  ;;  %2777 = vrcp.f32 %v1299_v42  ;;  %1559 = vrot.lane.b32.xlu1 %v3332_v24, %s2905_s29 }
 0x166   : > { %v2760_v59 = vpop.eup %2759  ;;  %v2337_v46 = vmul.f32 -1.442695, %v1183_v53  ;;  %v1080_v0 = vadd.f32 %v3209_v8, %v919_v39  ;;  %v1385_v36 = vadd.f32 %v3253_v1, %v3253_v1  ;;  %v2462_v54 = vadd.f32 %v2461_v34, %v2460_v6 }
 0x167   : > { %v2762_v50 = vpop.eup %2761  ;;  %v1300_v9 = vadd.f32 1.0, %v2760_v59  ;;  %v1181_v51 = vsel %vm1120_vm0, %v1149_v40, %v1104_v38  ;;  %v1152_v12 = vadd.f32 %v1115_v45, %v1115_v45  ;;  %v946_v32 = vadd.f32 %v3089_v43, %v3098_v57 }
 0x168   : > { %v3344_v55 = vpop.eup %2763  ;;  %v1307_v18 = vadd.f32 1.0, %v2762_v50  ;;  %2779 = vpow2.f32 %v2337_v46  ;;  %v1143_v25 = vadd.f32 %v1080_v0, %v1080_v0  ;;  %v2335_v61 = vmul.f32 -1.442695, %v1181_v51 }
 0x169   : > { %v2766_v62 = vpop.eup %2765  ;;  %v2347_v22 = vadd.f32 -1.0, %v1385_v36  ;;  %v922_v8 = vadd.f32 %v2462_v54, %v3098_v57  ;;  %2781 = vrcp.f32 %v1300_v9  ;;  %v1184_v6 = vsel %vm1120_vm0, %v1152_v12, %v1115_v45 }
 0x16a   : > { %v2768_v63 = vpop.eup %2767  ;;  %v1305_v4 = vadd.f32 1.0, %v2766_v62  ;;  %v1175_v37 = vsel %vm1120_vm0, %v1143_v25, %v1080_v0  ;;  %2783 = vrcp.f32 %v1307_v18  ;;  %v1107_v34 = vadd.f32 %v3300_v13, %v946_v32 }
 0x16b   : > { %v3353_v56 = vpop.eup %2769  ;;  %v1308_v48 = vadd.f32 1.0, %v2768_v63  ;;  %v2329_v11 = vmul.f32 -1.442695, %v1175_v37  ;;  %v3358_v19 = vsel %vm1120_vm0, %v2347_v22, %v3253_v1  ;;  %2785 = vpow2.f32 %v2335_v61 }
 0x16c   : > { %v2772_v43 = vpop.eup %2771  ;;  %1553 = vrot.lane.b32.xlu0 %v3358_v19, %s2905_s29  ;;  %v1083_v57 = vadd.f32 %v3226_v26, %v922_v8  ;;  %v1386_v16 = vadd.f32 %v3273_v14, %v3273_v14  ;;  %2787 = vrcp.f32 %v1305_v4  ;;  %v2338_v23 = vmul.f32 -1.442695, %v1184_v6 }
 0x16d   : > { %v2774_v21 = vpop.eup %2773  ;;  %v1389_v27 = vadd.f32 %v3287_v47, %v3287_v47  ;;  %v1390_v1 = vadd.f32 %v3298_v10, %v3298_v10  ;;  %2789 = vrcp.f32 %v1308_v48  ;;  %v1150_v17 = vadd.f32 %v1107_v34, %v1107_v34 }
 0x16e   : > { %v2776_v28 = vpop.eup %2775  ;;  %v1306_v29 = vadd.f32 1.0, %v2774_v21  ;;  %v1144_v30 = vadd.f32 %v1083_v57, %v1083_v57  ;;  %2791 = vpow2.f32 %v2329_v11  ;;  %v2348_v26 = vadd.f32 -1.0, %v1386_v16 }
 0x16f   : > { %v2351_v13 = vadd.f32 -1.0, %v1389_v27  ;;  %v2778_v33 = vpop.eup %2777  ;;  %v1301_v15 = vadd.f32 1.0, %v2772_v43  ;;  %v1182_v38 = vsel %vm1120_vm0, %v1150_v17, %v1107_v34  ;;  %v2352_v42 = vadd.f32 -1.0, %v1390_v1 }
 0x170   : > { %v1176_v35 = vsel %vm1120_vm0, %v1144_v30, %v1083_v57  ;;  %2793 = vrcp.f32 %v1306_v29  ;;  %v2336_v53 = vmul.f32 -1.442695, %v1182_v38  ;;  %v3377_v40 = vsel %vm1120_vm0, %v2348_v26, %v3273_v14 }
 0x171   : > { %v2330_v39 = vmul.f32 -1.442695, %v1176_v35  ;;  %v1302_v59 = vadd.f32 1.0, %v2776_v28  ;;  %2795 = vpow2.f32 %v2338_v23  ;;  %1555 = vrot.lane.b32.xlu1 %v3377_v40, %s2905_s29  ;;  %v3384_v46 = vsel %vm1120_vm0, %v2351_v13, %v3287_v47 }
 0x172   : > { %v2780_v45 = vpop.eup %2779  ;;  %v1391_v0 = vadd.f32 %v3302_v49, %v3302_v49  ;;  %1561 = vrot.lane.b32.xlu0 %v3384_v46, %s2905_s29  ;;  %v3393_v14 = vsel %vm1120_vm0, %v2352_v42, %v3298_v10  ;;  %v1392_v36 = vadd.f32 %v3325_v31, %v3325_v31  ;;  %v1393_v50 = vadd.f32 %v3344_v55, %v3344_v55 }
 0x173   : > { %2797 = vpow2.f32 %v2330_v39  ;;  %v2782_v47 = vpop.eup %2781  ;;  %v1394_v51 = vadd.f32 %v3353_v56, %v3353_v56  ;;  %v1395_v12 = vadd.f32 %v2778_v33, %v2778_v33  ;;  %v1311_v18 = vadd.f32 1.0, %v2780_v45 }
 0x174   : > { %2799 = vpow2.f32 %v2336_v53  ;;  %v2353_v9 = vadd.f32 -1.0, %v1391_v0  ;;  %v2784_v54 = vpop.eup %2783  ;;  %v2354_v25 = vadd.f32 -1.0, %v1392_v36  ;;  %v2355_v61 = vadd.f32 -1.0, %v1393_v50 }
 0x175   : > { %2801 = vrcp.f32 %v1301_v15  ;;  %v2786_v10 = vpop.eup %2785  ;;  %1563 = vrot.lane.b32.xlu1 %v3393_v14, %s2905_s29  ;;  %v2356_v32 = vadd.f32 -1.0, %v1394_v51  ;;  %v1396_v63 = vadd.f32 %v2782_v47, %v2782_v47  ;;  %v1403_v6 = vadd.f32 %v2784_v54, %v2784_v54 }
 0x176   : > { %v3406_v62 = vsel %vm1120_vm0, %v2353_v9, %v3302_v49  ;;  %v2788_v22 = vpop.eup %2787  ;;  %v3413_v8 = vsel %vm1120_vm0, %v2354_v25, %v3325_v31  ;;  %2803 = vrcp.f32 %v1302_v59  ;;  %v3418_v37 = vsel %vm1120_vm0, %v2355_v61, %v3344_v55 }
 0x177   : > { %1565 = vrot.lane.b32.xlu0 %v3406_v62, %s2905_s29  ;;  %v2790_v4 = vpop.eup %2789  ;;  %v2357_v49 = vadd.f32 -1.0, %v1395_v12  ;;  %2805 = vrcp.f32 %v1311_v18  ;;  %v1309_v11 = vadd.f32 1.0, %v2786_v10  ;;  %v3427_v31 = vsel %vm1120_vm0, %v2356_v32, %v3353_v56 }
 0x178   : > { %v2792_v48 = vpop.eup %2791  ;;  %v2358_v57 = vadd.f32 -1.0, %v1396_v63  ;;  %v1404_v55 = vadd.f32 %v2790_v4, %v2790_v4  ;;  %v2365_v23 = vadd.f32 -1.0, %v1403_v6  ;;  %v1401_v29 = vadd.f32 %v2788_v22, %v2788_v22 }
 0x179   : > { %1567 = vrot.lane.b32.xlu1 %v3413_v8, %s2905_s29  ;;  %v1303_v16 = vadd.f32 1.0, %v2792_v48  ;;  %v3431_v21 = vsel %vm1120_vm0, %v2357_v49, %v2778_v33  ;;  %2807 = vrcp.f32 %v1309_v11 }
 0x17a   : > { %v2794_v43 = vpop.eup %2793  ;;  %v3439_v17 = vsel %vm1120_vm0, %v2358_v57, %v2782_v47  ;;  %v2366_v26 = vadd.f32 -1.0, %v1404_v55  ;;  %v3443_v33 = vsel %vm1120_vm0, %v2365_v23, %v2784_v54  ;;  %v2363_v38 = vadd.f32 -1.0, %v1401_v29 }
 0x17b   : > { %1569 = vrot.lane.b32.xlu0 %v3418_v37, %s2905_s29  ;;  %v2796_v34 = vpop.eup %2795  ;;  %3977 = vst [vmem:[#allocation2_spill] sm:$0xff] %v3439_v17  ;;  %3978 = vst [vmem:[#allocation3_spill] sm:$0xff] %v3443_v33  ;;  %v1402_v15 = vadd.f32 %v2794_v43, %v2794_v43 }
 0x17c   : > { %v1312_v1 = vadd.f32 1.0, %v2796_v34  ;;  %v3451_v53 = vsel %vm1120_vm0, %v2366_v26, %v2790_v4  ;;  %v3457_v0 = vsel %vm1120_vm0, %v2363_v38, %v2788_v22 }
 0x17d   : > { %v2798_v27 = vpop.eup %2797  ;;  %1571 = vrot.lane.b32.xlu1 %v3427_v31, %s2905_s29  ;;  %3979 = vst [vmem:[#allocation4_spill] sm:$0xff] %v3451_v53  ;;  %v2364_v45 = vadd.f32 -1.0, %v1402_v15  ;;  %3980 = vst [vmem:[#allocation5_spill] sm:$0xff] %v3457_v0 }
 0x17e   : > { %v2800_v28 = vpop.eup %2799  ;;  %2809 = vrcp.f32 %v1312_v1  ;;  %v1304_v13 = vadd.f32 1.0, %v2798_v27 }
 0x17f   : > { %v2802_v30 = vpop.eup %2801  ;;  %v1310_v56 = vadd.f32 1.0, %v2800_v28  ;;  %1573 = vrot.lane.b32.xlu0 %v3431_v21, %s2905_s29  ;;  %2811 = vrcp.f32 %v1303_v16  ;;  %v3463_v51 = vsel %vm1120_vm0, %v2364_v45, %v2794_v43 }
 0x180   : > { %v2804_v35 = vpop.eup %2803  ;;  %v1397_v42 = vadd.f32 %v2802_v30, %v2802_v30 }
 0x181   : > { %2813 = vrcp.f32 %v1310_v56  ;;  %1575 = vrot.lane.b32.xlu1 %v3439_v17, %s2905_s29  ;;  %v2806_v39 = vpop.eup %2805  ;;  %v1398_v59 = vadd.f32 %v2804_v35, %v2804_v35 }
 0x182   : > { %2815 = vrcp.f32 %v1304_v13  ;;  %v2359_v36 = vadd.f32 -1.0, %v1397_v42  ;;  %v1407_v50 = vadd.f32 %v2806_v39, %v2806_v39 }
 0x183   : > { %1589 = vrot.lane.b32.xlu0 %v3443_v33, %s2905_s29  ;;  %v2808_v47 = vpop.eup %2807  ;;  %v2360_v12 = vadd.f32 -1.0, %v1398_v59 }
 0x184   : > { %v3469_v18 = vsel %vm1120_vm0, %v2359_v36, %v2802_v30  ;;  %v2369_v25 = vadd.f32 -1.0, %v1407_v50  ;;  %v1405_v10 = vadd.f32 %v2808_v47, %v2808_v47 }
 0x185   : > { %1591 = vrot.lane.b32.xlu1 %v3451_v53, %s2905_s29  ;;  %3981 = vst [vmem:[#allocation6_spill] sm:$0xff] %v3469_v18  ;;  %v3475_v32 = vsel %vm1120_vm0, %v2360_v12, %v2804_v35 }
 0x186   : > { %3982 = vst [vmem:[#allocation7_spill] sm:$0xff] %v3475_v32  ;;  %v3481_v6 = vsel %vm1120_vm0, %v2369_v25, %v2806_v39  ;;  %v2367_v48 = vadd.f32 -1.0, %v1405_v10 }
 0x187   : > { %1585 = vrot.lane.b32.xlu0 %v3457_v0, %s2905_s29 }
 0x188   : > { %v2810_v9 = vpop.eup %2809  ;;  %v3493_v34 = vsel %vm1120_vm0, %v2367_v48, %v2808_v47 }
 0x189   : > { %v2812_v54 = vpop.eup %2811  ;;  %1587 = vrot.lane.b32.xlu1 %v3463_v51, %s2905_s29  ;;  %v1408_v61 = vadd.f32 %v2810_v9, %v2810_v9  ;;  %3983 = vst [vmem:[#allocation8_spill] sm:$0xff] %v3493_v34 }
 0x18a   : > { %v1399_v11 = vadd.f32 %v2812_v54, %v2812_v54 }
 0x18b   : > { %v2814_v22 = vpop.eup %2813  ;;  %1577 = vrot.lane.b32.xlu0 %v3469_v18, %s2905_s29  ;;  %v2370_v63 = vadd.f32 -1.0, %v1408_v61 }
 0x18c   : > { %v1406_v4 = vadd.f32 %v2814_v22, %v2814_v22  ;;  %v2816_v49 = vpop.eup %2815  ;;  %v2361_v16 = vadd.f32 -1.0, %v1399_v11 }
 0x18d   : > { %1579 = vrot.lane.b32.xlu1 %v3475_v32, %s2905_s29  ;;  %v3487_v43 = vsel %vm1120_vm0, %v2370_v63, %v2810_v9  ;;  %v1400_v55 = vadd.f32 %v2816_v49, %v2816_v49 }
 0x18e   : > { %v2368_v57 = vadd.f32 -1.0, %v1406_v4  ;;  %v3505_v1 = vsel %vm1120_vm0, %v2361_v16, %v2812_v54 }
 0x18f   : > { %1597 = vrot.lane.b32.xlu0 %v3481_v6, %s2905_s29  ;;  %v2362_v27 = vadd.f32 -1.0, %v1400_v55 }
 0x190   : > { %v3499_v23 = vsel %vm1120_vm0, %v2368_v57, %v2814_v22 }
 0x191   : > { %1599 = vrot.lane.b32.xlu1 %v3487_v43, %s2905_s29  ;;  %v3511_v28 = vsel %vm1120_vm0, %v2362_v27, %v2816_v49 }
 0x193   : > { %1593 = vrot.lane.b32.xlu0 %v3493_v34, %s2905_s29 }
 0x195   : > { %1595 = vrot.lane.b32.xlu1 %v3499_v23, %s2905_s29 }
 0x197   : > { %1581 = vrot.lane.b32.xlu0 %v3505_v1, %s2905_s29 }
 0x199   : > { %1583 = vrot.lane.b32.xlu1 %v3511_v28, %s2905_s29 }
 0x1ba   : > { %v1542_v29 = vpop.permute.xlu1 %1541 }
 0x1bb   : > { %v1635_v30 = vmul.f32 %v1542_v29, %v3196_v60 }
 0x1bc   : > { %v1538_v56 = vpop.permute.xlu0 %1537 }
 0x1bd   : > { %1733 = vrot.lane.b32.xlu0 %v1635_v30, %s2905_s29  ;;  %v1633_v26 = vmul.f32 %v1538_v56, %v3203_v5 }
 0x1be   : > { %v1544_v13 = vpop.permute.xlu1 %1543 }
 0x1bf   : > { %v1636_v15 = vmul.f32 %v1544_v13, %v3224_v3 }
 0x1c1   : > { %1729 = vrot.lane.b32.xlu0 %v1633_v26, %s2905_s29  ;;  %1735 = vrot.lane.b32.xlu1 %v1636_v15, %s2905_s29 }
 0x1c2   : > { %v1540_v35 = vpop.permute.xlu0 %1539 }
 0x1c3   : > { %v1634_v38 = vmul.f32 %v1540_v35, %v3238_v41 }
 0x1c5   : > { %v1552_v39 = vpop.permute.xlu1 %1551  ;;  %1731 = vrot.lane.b32.xlu1 %v1634_v38, %s2905_s29 }
 0x1c6   : > { %v1550_v42 = vpop.permute.xlu0 %1549  ;;  %v1640_v59 = vmul.f32 %v1552_v39, %v3257_v2 }
 0x1c7   : > { %v1639_v45 = vmul.f32 %v1550_v42, %v3242_v44 }
 0x1c9   : > { %1741 = vrot.lane.b32.xlu0 %v1639_v45, %s2905_s29  ;;  %1743 = vrot.lane.b32.xlu1 %v1640_v59, %s2905_s29 }
 0x1ca   : > { %v1546_v36 = vpop.permute.xlu0 %1545 }
 0x1cb   : > { %v1637_v50 = vmul.f32 %v1546_v36, %v3263_v7 }
 0x1cd   : > { %1737 = vrot.lane.b32.xlu0 %v1637_v50, %s2905_s29 }
 0x1d3   : > { %v1548_v47 = vpop.permute.xlu1 %1547 }
 0x1d4   : > { %v1638_v9 = vmul.f32 %v1548_v47, %v3307_v20 }
 0x1d6   : > { %1739 = vrot.lane.b32.xlu1 %v1638_v9, %s2905_s29 }
 0x1d7   : > { %v1558_v12 = vpop.permute.xlu0 %1557  ;;  %v1560_v25 = vpop.permute.xlu1 %1559 }
 0x1d8   : > { %v1643_v54 = vmul.f32 %v1558_v12, %v3322_v52  ;;  %v1644_v61 = vmul.f32 %v1560_v25, %v3332_v24 }
 0x1da   : > { %1749 = vrot.lane.b32.xlu0 %v1643_v54, %s2905_s29  ;;  %1751 = vrot.lane.b32.xlu1 %v1644_v61, %s2905_s29 }
 0x1de   : > { %v1554_v10 = vpop.permute.xlu0 %1553 }
 0x1df   : > { %v1641_v22 = vmul.f32 %v1554_v10, %v3358_v19 }
 0x1e1   : > { %1745 = vrot.lane.b32.xlu0 %v1641_v22, %s2905_s29 }
 0x1e3   : > { %v1556_v63 = vpop.permute.xlu1 %1555 }
 0x1e4   : > { %v1642_v4 = vmul.f32 %v1556_v63, %v3377_v40  ;;  %v1562_v49 = vpop.permute.xlu0 %1561 }
 0x1e5   : > { %v1645_v48 = vmul.f32 %v1562_v49, %v3384_v46 }
 0x1e6   : > { %1747 = vrot.lane.b32.xlu1 %v1642_v4, %s2905_s29 }
 0x1e7   : > { %v1564_v11 = vpop.permute.xlu1 %1563  ;;  %1753 = vrot.lane.b32.xlu0 %v1645_v48, %s2905_s29 }
 0x1e8   : > { %v1646_v57 = vmul.f32 %v1564_v11, %v3393_v14 }
 0x1e9   : > { %v1566_v55 = vpop.permute.xlu0 %1565 }
 0x1ea   : > { %v1647_v16 = vmul.f32 %v1566_v55, %v3406_v62  ;;  %1755 = vrot.lane.b32.xlu1 %v1646_v57, %s2905_s29 }
 0x1eb   : > { %v1568_v27 = vpop.permute.xlu1 %1567 }
 0x1ec   : > { %1757 = vrot.lane.b32.xlu0 %v1647_v16, %s2905_s29  ;;  %v1648_v29 = vmul.f32 %v1568_v27, %v3413_v8 }
 0x1ed   : > { %v1570_v30 = vpop.permute.xlu0 %1569 }
 0x1ee   : > { %v1649_v56 = vmul.f32 %v1570_v30, %v3418_v37  ;;  %1759 = vrot.lane.b32.xlu1 %v1648_v29, %s2905_s29 }
 0x1ef   : > { %v1572_v26 = vpop.permute.xlu1 %1571 }
 0x1f0   : > { %1761 = vrot.lane.b32.xlu0 %v1649_v56, %s2905_s29  ;;  %v1650_v13 = vmul.f32 %v1572_v26, %v3427_v31  ;;  %v1475_v56 = vld [vmem:[%s3585_s7 + $0x10] sm:$0xff] }
 0x1f1   : > { %v1574_v15 = vpop.permute.xlu0 %1573  ;;  %v1667_v26 = vmul.f32 %v1475_v56, %v3196_v60  ;;  %v1478_v56 = vld [vmem:[%s3585_s7 + $0x28] sm:$0xff] }
 0x1f2   : > { %v1651_v35 = vmul.f32 %v1574_v15, %v3431_v21  ;;  %1763 = vrot.lane.b32.xlu1 %v1650_v13, %s2905_s29  ;;  %v1473_v15 = vld [vmem:[%s3585_s7] sm:$0xff] }
 0x1f3   : > { %v1576_v38 = vpop.permute.xlu1 %1575 }
 0x1f4   : > { %1765 = vrot.lane.b32.xlu0 %v1651_v35, %s2905_s29  ;;  %v1652_v42 = vmul.f32 %v1576_v38, %v3439_v17  ;;  %v1476_v38 = vld [vmem:[%s3585_s7 + $0x18] sm:$0xff] }
 0x1f5   : > { %v1590_v39 = vpop.permute.xlu0 %1589 }
 0x1f6   : > { %v1659_v45 = vmul.f32 %v1590_v39, %v3443_v33  ;;  %1767 = vrot.lane.b32.xlu1 %v1652_v42, %s2905_s29  ;;  %v1665_v42 = vmul.f32 %v1473_v15, %v3203_v5  ;;  %v1668_v39 = vmul.f32 %v1476_v38, %v3224_v3  ;;  %v1483_v38 = vld [vmem:[%s3585_s7 + $0x50] sm:$0xff] }
 0x1f7   : > { %v1592_v59 = vpop.permute.xlu1 %1591 }
 0x1f8   : > { %1781 = vrot.lane.b32.xlu0 %v1659_v45, %s2905_s29  ;;  %v1660_v36 = vmul.f32 %v1592_v59, %v3451_v53 }
 0x1f9   : > { %v1586_v50 = vpop.permute.xlu0 %1585 }
 0x1fa   : > { %v1657_v47 = vmul.f32 %v1586_v50, %v3457_v0  ;;  %1783 = vrot.lane.b32.xlu1 %v1660_v36, %s2905_s29  ;;  %v1474_v50 = vld [vmem:[%s3585_s7 + $0x8] sm:$0xff] }
 0x1fb   : > { %v1588_v9 = vpop.permute.xlu1 %1587 }
 0x1fc   : > { %1777 = vrot.lane.b32.xlu0 %v1657_v47, %s2905_s29  ;;  %v1658_v12 = vmul.f32 %v1588_v9, %v3463_v51  ;;  %v1666_v9 = vmul.f32 %v1474_v50, %v3238_v41  ;;  %v1675_v50 = vmul.f32 %v1483_v38, %v3322_v52 }
 0x1fd   : > { %v1578_v54 = vpop.permute.xlu0 %1577 }
 0x1fe   : > { %v1653_v25 = vmul.f32 %v1578_v54, %v3469_v18  ;;  %1779 = vrot.lane.b32.xlu1 %v1658_v12, %s2905_s29  ;;  %v1479_v12 = vld [vmem:[%s3585_s7 + $0x30] sm:$0xff] }
 0x1ff   : > { %v1580_v61 = vpop.permute.xlu1 %1579 }
 0x200   : > { %1769 = vrot.lane.b32.xlu0 %v1653_v25, %s2905_s29  ;;  %v1654_v10 = vmul.f32 %v1580_v61, %v3475_v32  ;;  %v1480_v25 = vld [vmem:[%s3585_s7 + $0x38] sm:$0xff] }
 0x201   : > { %v1598_v22 = vpop.permute.xlu0 %1597 }
 0x202   : > { %1771 = vrot.lane.b32.xlu1 %v1654_v10, %s2905_s29  ;;  %v1663_v29 = vmul.f32 %v1598_v22, %v3481_v6  ;;  %v1671_v10 = vmul.f32 %v1479_v12, %v3242_v44 }
 0x203   : > { %v1600_v63 = vpop.permute.xlu1 %1599 }
 0x204   : > { %v1664_v30 = vmul.f32 %v1600_v63, %v3487_v43  ;;  %v1672_v63 = vmul.f32 %v1480_v25, %v3257_v2 }
 0x205   : > { %v1594_v4 = vpop.permute.xlu0 %1593 }
 0x206   : > { %v1661_v49 = vmul.f32 %v1594_v4, %v3493_v34  ;;  %v1477_v4 = vld [vmem:[%s3585_s7 + $0x20] sm:$0xff] }
 0x207   : > { %v1596_v48 = vpop.permute.xlu1 %1595 }
 0x208   : > { %1785 = vrot.lane.b32.xlu0 %v1661_v49, %s2905_s29  ;;  %v1662_v11 = vmul.f32 %v1596_v48, %v3499_v23 }
 0x209   : > { %v1582_v57 = vpop.permute.xlu0 %1581 }
 0x20a   : > { %v1655_v55 = vmul.f32 %v1582_v57, %v3505_v1  ;;  %1787 = vrot.lane.b32.xlu1 %v1662_v11, %s2905_s29 }
 0x20b   : > { %v1584_v16 = vpop.permute.xlu1 %1583 }
 0x20c   : > { %1773 = vrot.lane.b32.xlu0 %v1655_v55, %s2905_s29  ;;  %v1656_v27 = vmul.f32 %v1584_v16, %v3511_v28  ;;  %v1669_v55 = vmul.f32 %v1477_v4, %v3263_v7 }
 0x20e   : > { %1775 = vrot.lane.b32.xlu1 %v1656_v27, %s2905_s29 }
 0x210   : > { %1789 = vrot.lane.b32.xlu0 %v1663_v29, %s2905_s29 }
 0x212   : > { %1791 = vrot.lane.b32.xlu1 %v1664_v30, %s2905_s29 }
 0x22f   : > { %v1734_v13 = vpop.permute.xlu0 %1733 }
 0x230   : > { %v3590_v35 = vadd.f32 %v1734_v13, %v1667_v26  ;;  %v1670_v13 = vmul.f32 %v1478_v56, %v3307_v20 }
 0x232   : > { %2817 = vtanh.f32 %v3590_v35 }
 0x233   : > { %v1730_v45 = vpop.permute.xlu0 %1729  ;;  %v1736_v59 = vpop.permute.xlu1 %1735 }
 0x234   : > { %v3596_v36 = vadd.f32 %v1730_v45, %v1665_v42  ;;  %v3599_v47 = vadd.f32 %v1736_v59, %v1668_v39  ;;  %v1484_v39 = vld [vmem:[%s3585_s7 + $0x58] sm:$0xff] }
 0x235   : > { %v1676_v12 = vmul.f32 %v1484_v39, %v3332_v24 }
 0x236   : > { %2819 = vtanh.f32 %v3596_v36 }
 0x237   : > { %2821 = vtanh.f32 %v3599_v47  ;;  %v1732_v54 = vpop.permute.xlu1 %1731 }
 0x238   : > { %v3606_v61 = vadd.f32 %v1732_v54, %v1666_v9 }
 0x23a   : > { %2823 = vtanh.f32 %v3606_v61 }
 0x23b   : > { %v1742_v22 = vpop.permute.xlu0 %1741  ;;  %v1744_v11 = vpop.permute.xlu1 %1743 }
 0x23c   : > { %v2818_v49 = vpop.eup %2817  ;;  %v3612_v48 = vadd.f32 %v1742_v22, %v1671_v10  ;;  %v3614_v57 = vadd.f32 %v1744_v11, %v1672_v63  ;;  %v1481_v63 = vld [vmem:[%s3585_s7 + $0x40] sm:$0xff] }
 0x23d   : > { %1925 = vrot.lane.b32.xlu0 %v2818_v49, %s2905_s29  ;;  %v1673_v4 = vmul.f32 %v1481_v63, %v3358_v19 }
 0x23e   : > { %2825 = vtanh.f32 %v3612_v48 }
 0x23f   : > { %2827 = vtanh.f32 %v3614_v57  ;;  %v1738_v16 = vpop.permute.xlu0 %1737 }
 0x240   : > { %v2820_v27 = vpop.eup %2819  ;;  %v3620_v29 = vadd.f32 %v1738_v16, %v1669_v55  ;;  %v1482_v16 = vld [vmem:[%s3585_s7 + $0x48] sm:$0xff] }
 0x241   : > { %v2822_v30 = vpop.eup %2821  ;;  %1921 = vrot.lane.b32.xlu0 %v2820_v27, %s2905_s29  ;;  %v1485_v27 = vld [vmem:[%s3585_s7 + $0x60] sm:$0xff] }
 0x242   : > { %2829 = vtanh.f32 %v3620_v29  ;;  %1927 = vrot.lane.b32.xlu1 %v2822_v30, %s2905_s29  ;;  %v1674_v30 = vmul.f32 %v1482_v16, %v3377_v40 }
 0x244   : > { %v2824_v26 = vpop.eup %2823 }
 0x246   : > { %1923 = vrot.lane.b32.xlu1 %v2824_v26, %s2905_s29 }
 0x248   : > { %v1740_v15 = vpop.permute.xlu1 %1739  ;;  %v2826_v45 = vpop.eup %2825 }
 0x249   : > { %v3629_v42 = vadd.f32 %v1740_v15, %v1670_v13  ;;  %v2828_v59 = vpop.eup %2827  ;;  %1933 = vrot.lane.b32.xlu0 %v2826_v45, %s2905_s29  ;;  %v1677_v13 = vmul.f32 %v1485_v27, %v3384_v46  ;;  %v1486_v15 = vld [vmem:[%s3585_s7 + $0x68] sm:$0xff] }
 0x24a   : > { %1935 = vrot.lane.b32.xlu1 %v2828_v59, %s2905_s29  ;;  %v1487_v59 = vld [vmem:[%s3585_s7 + $0x70] sm:$0xff] }
 0x24b   : > { %2831 = vtanh.f32 %v3629_v42 }
 0x24c   : > { %v1750_v9 = vpop.permute.xlu0 %1749  ;;  %v1752_v25 = vpop.permute.xlu1 %1751 }
 0x24d   : > { %v3637_v54 = vadd.f32 %v1750_v9, %v1675_v50  ;;  %v2830_v10 = vpop.eup %2829  ;;  %v3639_v22 = vadd.f32 %v1752_v25, %v1676_v12  ;;  %v1678_v9 = vmul.f32 %v1486_v15, %v3393_v14  ;;  %v1679_v25 = vmul.f32 %v1487_v59, %v3406_v62 }
 0x24e   : > { %1929 = vrot.lane.b32.xlu0 %v2830_v10, %s2905_s29  ;;  %v1488_v10 = vld [vmem:[%s3585_s7 + $0x78] sm:$0xff] }
 0x24f   : > { %2833 = vtanh.f32 %v3637_v54  ;;  %v1680_v27 = vmul.f32 %v1488_v10, %v3413_v8 }
 0x250   : > { %2835 = vtanh.f32 %v3639_v22 }
 0x253   : > { %v1746_v49 = vpop.permute.xlu0 %1745 }
 0x254   : > { %v3646_v11 = vadd.f32 %v1746_v49, %v1673_v4  ;;  %v1489_v49 = vld [vmem:[%s3585_s7 + $0x80] sm:$0xff] }
 0x255   : > { %v2832_v55 = vpop.eup %2831 }
 0x256   : > { %2837 = vtanh.f32 %v3646_v11  ;;  %1931 = vrot.lane.b32.xlu1 %v2832_v55, %s2905_s29 }
 0x258   : > { %v1748_v26 = vpop.permute.xlu1 %1747 }
 0x259   : > { %v2834_v56 = vpop.eup %2833  ;;  %v3655_v39 = vadd.f32 %v1748_v26, %v1674_v30  ;;  %v1754_v45 = vpop.permute.xlu0 %1753  ;;  %v1490_v26 = vld [vmem:[%s3585_s7 + $0x88] sm:$0xff] }
 0x25a   : > { %v2836_v38 = vpop.eup %2835  ;;  %1941 = vrot.lane.b32.xlu0 %v2834_v56, %s2905_s29  ;;  %v3659_v50 = vadd.f32 %v1754_v45, %v1677_v13  ;;  %v1681_v56 = vmul.f32 %v1489_v49, %v3418_v37  ;;  %v1682_v59 = vmul.f32 %v1490_v26, %v3427_v31 }
 0x25b   : > { %1943 = vrot.lane.b32.xlu1 %v2836_v38, %s2905_s29  ;;  %2839 = vtanh.f32 %v3655_v39  ;;  %v1491_v38 = vld [vmem:[%s3585_s7 + $0x90] sm:$0xff] }
 0x25c   : > { %2841 = vtanh.f32 %v3659_v50  ;;  %v1756_v12 = vpop.permute.xlu1 %1755 }
 0x25d   : > { %v3667_v63 = vadd.f32 %v1756_v12, %v1678_v9  ;;  %v1683_v12 = vmul.f32 %v1491_v38, %v3431_v21  ;;  %v1500_v38 = vld [vmem:[%s3585_s7 + $0xd8] sm:$0xff] }
 0x25e   : > { %v1758_v4 = vpop.permute.xlu0 %1757 }
 0x25f   : > { %v3670_v55 = vadd.f32 %v1758_v4, %v1679_v25  ;;  %2843 = vtanh.f32 %v3667_v63  ;;  %v1492_v25 = vld [vmem:[%s3585_s7 + $0x98] sm:$0xff] }
 0x260   : > { %v2838_v16 = vpop.eup %2837  ;;  %v1760_v30 = vpop.permute.xlu1 %1759 }
 0x261   : > { %2845 = vtanh.f32 %v3670_v55  ;;  %1937 = vrot.lane.b32.xlu0 %v2838_v16, %s2905_s29  ;;  %v3678_v13 = vadd.f32 %v1760_v30, %v1680_v27  ;;  %v1499_v16 = vld [vmem:[%s3585_s7 + $0xd0] sm:$0xff] }
 0x262   : > { %v1762_v15 = vpop.permute.xlu0 %1761 }
 0x263   : > { %v3681_v45 = vadd.f32 %v1762_v15, %v1681_v56  ;;  %2847 = vtanh.f32 %v3678_v13  ;;  %v1684_v56 = vmul.f32 %v1492_v25, %v3439_v17  ;;  %v1691_v15 = vmul.f32 %v1499_v16, %v3443_v33 }
 0x264   : > { %v1764_v9 = vpop.permute.xlu1 %1763  ;;  %v1692_v25 = vmul.f32 %v1500_v38, %v3451_v53 }
 0x265   : > { %2849 = vtanh.f32 %v3681_v45  ;;  %v2840_v10 = vpop.eup %2839  ;;  %v3688_v4 = vadd.f32 %v1764_v9, %v1682_v59 }
 0x266   : > { %v1766_v49 = vpop.permute.xlu0 %1765  ;;  %v2842_v27 = vpop.eup %2841  ;;  %1939 = vrot.lane.b32.xlu1 %v2840_v10, %s2905_s29 }
 0x267   : > { %3984 = vst [vmem:[#allocation9_spill] sm:$0xff] %v3688_v4  ;;  %v3692_v30 = vadd.f32 %v1766_v49, %v1683_v12  ;;  %2851 = vtanh.f32 %v3688_v4  ;;  %1945 = vrot.lane.b32.xlu0 %v2842_v27, %s2905_s29  ;;  %v1497_v12 = vld [vmem:[%s3585_s7 + $0xc0] sm:$0xff] }
 0x268   : > { %v1768_v26 = vpop.permute.xlu1 %1767  ;;  %v1689_v27 = vmul.f32 %v1497_v12, %v3457_v0 }
 0x269   : > { %2853 = vtanh.f32 %v3692_v30  ;;  %v2844_v59 = vpop.eup %2843  ;;  %v3700_v9 = vadd.f32 %v1768_v26, %v1684_v56  ;;  %v1498_v56 = vld [vmem:[%s3585_s7 + $0xc8] sm:$0xff] }
 0x26a   : > { %v1782_v10 = vpop.permute.xlu0 %1781  ;;  %1947 = vrot.lane.b32.xlu1 %v2844_v59, %s2905_s29  ;;  %v1493_v59 = vld [vmem:[%s3585_s7 + $0xa0] sm:$0xff]  ;;  %v1690_v38 = vmul.f32 %v1498_v56, %v3463_v51 }
 0x26b   : > { %v2846_v49 = vpop.eup %2845  ;;  %v3704_v4 = vadd.f32 %v1782_v10, %v1691_v15  ;;  %2855 = vtanh.f32 %v3700_v9 }
 0x26c   : > { %1949 = vrot.lane.b32.xlu0 %v2846_v49, %s2905_s29  ;;  %v1784_v16 = vpop.permute.xlu1 %1783  ;;  %v1685_v49 = vmul.f32 %v1493_v59, %v3469_v18 }
 0x26d   : > { %2857 = vtanh.f32 %v3704_v4  ;;  %v2848_v26 = vpop.eup %2847  ;;  %v3712_v33 = vadd.f32 %v1784_v16, %v1692_v25  ;;  %v1494_v25 = vld [vmem:[%s3585_s7 + $0xa8] sm:$0xff] }
 0x26e   : > { %v1778_v17 = vpop.permute.xlu0 %1777  ;;  %1951 = vrot.lane.b32.xlu1 %v2848_v26, %s2905_s29 }
 0x26f   : > { %v2850_v15 = vpop.eup %2849  ;;  %v3716_v10 = vadd.f32 %v1778_v17, %v1689_v27  ;;  %2859 = vtanh.f32 %v3712_v33  ;;  %v1686_v27 = vmul.f32 %v1494_v25, %v3475_v32 }
 0x270   : > { %1953 = vrot.lane.b32.xlu0 %v2850_v15, %s2905_s29  ;;  %v1780_v12 = vpop.permute.xlu1 %1779 }
 0x271   : > { %2861 = vtanh.f32 %v3716_v10  ;;  %v2852_v16 = vpop.eup %2851  ;;  %v3724_v0 = vadd.f32 %v1780_v12, %v1690_v38  ;;  %v1501_v38 = vld [vmem:[%s3585_s7 + $0xe0] sm:$0xff] }
 0x272   : > { %v1770_v53 = vpop.permute.xlu0 %1769  ;;  %1955 = vrot.lane.b32.xlu1 %v2852_v16, %s2905_s29 }
 0x273   : > { %3985 = vst [vmem:[#allocation10_spill] sm:$0xff] %v3724_v0  ;;  %v2854_v26 = vpop.eup %2853  ;;  %v3727_v17 = vadd.f32 %v1770_v53, %v1685_v49  ;;  %2863 = vtanh.f32 %v3724_v0  ;;  %v1693_v53 = vmul.f32 %v1501_v38, %v3493_v34  ;;  %v1502_v49 = vld [vmem:[%s3585_s7 + $0xe8] sm:$0xff]  ;;  %v1503_v0 = vld [vmem:[%s3585_s7 + $0xf0] sm:$0xff] }
 0x274   : > { %1957 = vrot.lane.b32.xlu0 %v2854_v26, %s2905_s29  ;;  %v1772_v56 = vpop.permute.xlu1 %1771  ;;  %v1495_v26 = vld [vmem:[%s3585_s7 + $0xb0] sm:$0xff] }
 0x275   : > { %3986 = vst [vmem:[#allocation11_spill] sm:$0xff] %v3727_v17  ;;  %2865 = vtanh.f32 %v3727_v17  ;;  %v2856_v59 = vpop.eup %2855  ;;  %v3733_v15 = vadd.f32 %v1772_v56, %v1686_v27  ;;  %v1694_v56 = vmul.f32 %v1502_v49, %v3499_v23  ;;  %v1687_v38 = vmul.f32 %v1495_v26, %v3505_v1 }
 0x276   : > { %1959 = vrot.lane.b32.xlu1 %v2856_v59, %s2905_s29 }
 0x277   : > { %3987 = vst [vmem:[#allocation12_spill] sm:$0xff] %v3733_v15  ;;  %v2858_v12 = vpop.eup %2857  ;;  %2867 = vtanh.f32 %v3733_v15 }
 0x278   : > { %1973 = vrot.lane.b32.xlu0 %v2858_v12, %s2905_s29  ;;  %v1496_v12 = vld [vmem:[%s3585_s7 + $0xb8] sm:$0xff] }
 0x279   : > { %v2860_v25 = vpop.eup %2859 }
 0x27a   : > { %v1786_v16 = vpop.permute.xlu0 %1785  ;;  %1975 = vrot.lane.b32.xlu1 %v2860_v25, %s2905_s29  ;;  %v1695_v25 = vmul.f32 %v1503_v0, %v3481_v6 }
 0x27b   : > { %v2862_v32 = vpop.eup %2861  ;;  %v3743_v27 = vadd.f32 %v1786_v16, %v1693_v53  ;;  %v1504_v16 = vld [vmem:[%s3585_s7 + $0xf8] sm:$0xff] }
 0x27c   : > { %1969 = vrot.lane.b32.xlu0 %v2862_v32, %s2905_s29  ;;  %v1788_v59 = vpop.permute.xlu1 %1787  ;;  %v1688_v32 = vmul.f32 %v1496_v12, %v3511_v28 }
 0x27d   : > { %2869 = vtanh.f32 %v3743_v27  ;;  %v2864_v34 = vpop.eup %2863  ;;  %v3750_v15 = vadd.f32 %v1788_v59, %v1694_v56 }
 0x27e   : > { %v1774_v17 = vpop.permute.xlu0 %1773  ;;  %1971 = vrot.lane.b32.xlu1 %v2864_v34, %s2905_s29 }
 0x27f   : > { %v2866_v18 = vpop.eup %2865  ;;  %v3754_v53 = vadd.f32 %v1774_v17, %v1687_v38  ;;  %2871 = vtanh.f32 %v3750_v15  ;;  %v1696_v17 = vmul.f32 %v1504_v16, %v3487_v43 }
 0x280   : > { %1961 = vrot.lane.b32.xlu0 %v2866_v18, %s2905_s29  ;;  %v1776_v49 = vpop.permute.xlu1 %1775 }
 0x281   : > { %2873 = vtanh.f32 %v3754_v53  ;;  %v2868_v26 = vpop.eup %2867  ;;  %v3762_v56 = vadd.f32 %v1776_v49, %v1688_v32 }
 0x282   : > { %v1790_v59 = vpop.permute.xlu0 %1789  ;;  %1963 = vrot.lane.b32.xlu1 %v2868_v26, %s2905_s29 }
 0x283   : > { %v3765_v34 = vadd.f32 %v1790_v59, %v1695_v25  ;;  %2875 = vtanh.f32 %v3762_v56 }
 0x284   : > { %v1792_v18 = vpop.permute.xlu1 %1791 }
 0x285   : > { %2877 = vtanh.f32 %v3765_v34  ;;  %v3770_v38 = vadd.f32 %v1792_v18, %v1696_v17 }
 0x287   : > { %v2870_v12 = vpop.eup %2869  ;;  %2879 = vtanh.f32 %v3770_v38 }
 0x288   : > { %1977 = vrot.lane.b32.xlu0 %v2870_v12, %s2905_s29 }
 0x289   : > { %v2872_v0 = vpop.eup %2871 }
 0x28a   : > { %1979 = vrot.lane.b32.xlu1 %v2872_v0, %s2905_s29 }
 0x28b   : > { %v2874_v32 = vpop.eup %2873 }
 0x28c   : > { %1965 = vrot.lane.b32.xlu0 %v2874_v32, %s2905_s29 }
 0x28d   : > { %v2876_v49 = vpop.eup %2875 }
 0x28e   : > { %1967 = vrot.lane.b32.xlu1 %v2876_v49, %s2905_s29 }
 0x28f   : > { %v2878_v25 = vpop.eup %2877 }
 0x290   : > { %1981 = vrot.lane.b32.xlu0 %v2878_v25, %s2905_s29 }
 0x291   : > { %v2880_v16 = vpop.eup %2879 }
 0x292   : > { %1983 = vrot.lane.b32.xlu1 %v2880_v16, %s2905_s29 }
 0x2af   : > { %v1926_v59 = vpop.permute.xlu0 %1925 }
 0x2b0   : > { %v2019_v17 = vmul.f32 %v1926_v59, %v3196_v60 }
 0x2b2   : > { %v2054_v58 = vsel %vm3781_vm3, %v3590_v35, %v2019_v17 }
 0x2b3   : > { %2086 = vst [vmem:[%s3790_s10 + $0x10] sm:$0xff] %v2054_v58  ;;  %v1922_v18 = vpop.permute.xlu0 %1921 }
 0x2b4   : > { %v1928_v12 = vpop.permute.xlu1 %1927  ;;  %v2017_v0 = vmul.f32 %v1922_v18, %v3203_v5 }
 0x2b5   : > { %v2020_v32 = vmul.f32 %v1928_v12, %v3224_v3 }
 0x2b6   : > { %v2052_v49 = vsel %vm3781_vm3, %v3596_v36, %v2017_v0 }
 0x2b7   : > { %v2055_v60 = vsel %vm3781_vm3, %v3599_v47, %v2020_v32  ;;  %2084 = vst [vmem:[%s3790_s10] sm:$0xff] %v2052_v49 }
 0x2b8   : > { %2087 = vst [vmem:[%s3790_s10 + $0x18] sm:$0xff] %v2055_v60  ;;  %v1924_v35 = vpop.permute.xlu1 %1923 }
 0x2b9   : > { %v2018_v25 = vmul.f32 %v1924_v35, %v3238_v41 }
 0x2bb   : > { %v2053_v5 = vsel %vm3781_vm3, %v3606_v61, %v2018_v25  ;;  %v1934_v3 = vpop.permute.xlu0 %1933 }
 0x2bc   : > { %2085 = vst [vmem:[%s3790_s10 + $0x8] sm:$0xff] %v2053_v5  ;;  %v2023_v36 = vmul.f32 %v1934_v3, %v3242_v44  ;;  %v1936_v16 = vpop.permute.xlu1 %1935 }
 0x2bd   : > { %v2024_v59 = vmul.f32 %v1936_v16, %v3257_v2  ;;  %v3990_v16 = vld [vmem:[#allocation9_spill] sm:$0xff] }
 0x2be   : > { %v2058_v47 = vsel %vm3781_vm3, %v3612_v48, %v2023_v36 }
 0x2bf   : > { %2090 = vst [vmem:[%s3790_s10 + $0x30] sm:$0xff] %v2058_v47  ;;  %v2059_v41 = vsel %vm3781_vm3, %v3614_v57, %v2024_v59 }
 0x2c0   : > { %v1930_v17 = vpop.permute.xlu0 %1929  ;;  %2091 = vst [vmem:[%s3790_s10 + $0x38] sm:$0xff] %v2059_v41 }
 0x2c1   : > { %v2021_v61 = vmul.f32 %v1930_v17, %v3263_v7 }
 0x2c3   : > { %v2056_v44 = vsel %vm3781_vm3, %v3620_v29, %v2021_v61 }
 0x2c4   : > { %2088 = vst [vmem:[%s3790_s10 + $0x20] sm:$0xff] %v2056_v44 }
 0x2c8   : > { %v1932_v2 = vpop.permute.xlu1 %1931 }
 0x2c9   : > { %v2022_v48 = vmul.f32 %v1932_v2, %v3307_v20 }
 0x2cb   : > { %v2057_v58 = vsel %vm3781_vm3, %v3629_v42, %v2022_v48 }
 0x2cc   : > { %2089 = vst [vmem:[%s3790_s10 + $0x28] sm:$0xff] %v2057_v58  ;;  %v1942_v57 = vpop.permute.xlu0 %1941  ;;  %v3994_v58 = vld [vmem:[#allocation5_spill] sm:$0xff] }
 0x2cd   : > { %v2027_v18 = vmul.f32 %v1942_v57, %v3322_v52  ;;  %v1944_v12 = vpop.permute.xlu1 %1943 }
 0x2ce   : > { %v2028_v7 = vmul.f32 %v1944_v12, %v3332_v24 }
 0x2cf   : > { %v2062_v29 = vsel %vm3781_vm3, %v3637_v54, %v2027_v18 }
 0x2d0   : > { %2094 = vst [vmem:[%s3790_s10 + $0x50] sm:$0xff] %v2062_v29  ;;  %v2063_v20 = vsel %vm3781_vm3, %v3639_v22, %v2028_v7  ;;  %v3995_v29 = vld [vmem:[#allocation6_spill] sm:$0xff] }
 0x2d1   : > { %2095 = vst [vmem:[%s3790_s10 + $0x58] sm:$0xff] %v2063_v20 }
 0x2d3   : > { %v1938_v42 = vpop.permute.xlu0 %1937 }
 0x2d4   : > { %v2025_v0 = vmul.f32 %v1938_v42, %v3358_v19  ;;  %v3996_v42 = vld [vmem:[#allocation10_spill] sm:$0xff] }
 0x2d6   : > { %v2060_v52 = vsel %vm3781_vm3, %v3646_v11, %v2025_v0 }
 0x2d7   : > { %2092 = vst [vmem:[%s3790_s10 + $0x40] sm:$0xff] %v2060_v52  ;;  %v3997_v52 = vld [vmem:[#allocation11_spill] sm:$0xff] }
 0x2d8   : > { %v1940_v24 = vpop.permute.xlu1 %1939 }
 0x2d9   : > { %v2026_v54 = vmul.f32 %v1940_v24, %v3377_v40  ;;  %v1946_v32 = vpop.permute.xlu0 %1945 }
 0x2da   : > { %v2029_v49 = vmul.f32 %v1946_v32, %v3384_v46  ;;  %v3999_v32 = vld [vmem:[#allocation12_spill] sm:$0xff] }
 0x2db   : > { %v2061_v22 = vsel %vm3781_vm3, %v3655_v39, %v2026_v54 }
 0x2dc   : > { %2093 = vst [vmem:[%s3790_s10 + $0x48] sm:$0xff] %v2061_v22  ;;  %v2064_v19 = vsel %vm3781_vm3, %v3659_v50, %v2029_v49  ;;  %v1948_v60 = vpop.permute.xlu1 %1947  ;;  %v4000_v22 = vld [vmem:[#allocation8_spill] sm:$0xff] }
 0x2dd   : > { %2096 = vst [vmem:[%s3790_s10 + $0x60] sm:$0xff] %v2064_v19  ;;  %v2030_v11 = vmul.f32 %v1948_v60, %v3393_v14 }
 0x2de   : > { %v1950_v35 = vpop.permute.xlu0 %1949 }
 0x2df   : > { %v2031_v40 = vmul.f32 %v1950_v35, %v3406_v62  ;;  %v2065_v46 = vsel %vm3781_vm3, %v3667_v63, %v2030_v11 }
 0x2e0   : > { %2097 = vst [vmem:[%s3790_s10 + $0x68] sm:$0xff] %v2065_v46  ;;  %v1952_v25 = vpop.permute.xlu1 %1951 }
 0x2e1   : > { %v2066_v39 = vsel %vm3781_vm3, %v3670_v55, %v2031_v40  ;;  %v2032_v50 = vmul.f32 %v1952_v25, %v3413_v8 }
 0x2e2   : > { %2098 = vst [vmem:[%s3790_s10 + $0x70] sm:$0xff] %v2066_v39  ;;  %v1954_v5 = vpop.permute.xlu0 %1953 }
 0x2e3   : > { %v2033_v14 = vmul.f32 %v1954_v5, %v3418_v37  ;;  %v2067_v62 = vsel %vm3781_vm3, %v3678_v13, %v2032_v50 }
 0x2e4   : > { %2099 = vst [vmem:[%s3790_s10 + $0x78] sm:$0xff] %v2067_v62  ;;  %v1956_v3 = vpop.permute.xlu1 %1955 }
 0x2e5   : > { %v2068_v63 = vsel %vm3781_vm3, %v3681_v45, %v2033_v14  ;;  %v2034_v55 = vmul.f32 %v1956_v3, %v3427_v31  ;;  %v3991_v45 = vld [vmem:[#allocation2_spill] sm:$0xff]  ;;  %v3992_v31 = vld [vmem:[#allocation3_spill] sm:$0xff] }
 0x2e6   : > { %2100 = vst [vmem:[%s3790_s10 + $0x80] sm:$0xff] %v2068_v63  ;;  %v1958_v36 = vpop.permute.xlu0 %1957 }
 0x2e7   : > { %v2035_v8 = vmul.f32 %v1958_v36, %v3431_v21  ;;  %v2069_v37 = vsel %vm3781_vm3, %v3990_v16, %v2034_v55 }
 0x2e8   : > { %2101 = vst [vmem:[%s3790_s10 + $0x88] sm:$0xff] %v2069_v37  ;;  %v1960_v59 = vpop.permute.xlu1 %1959 }
 0x2e9   : > { %v2070_v13 = vsel %vm3781_vm3, %v3692_v30, %v2035_v8  ;;  %v2036_v47 = vmul.f32 %v1960_v59, %v3991_v45  ;;  %v3993_v30 = vld [vmem:[#allocation4_spill] sm:$0xff] }
 0x2ea   : > { %2102 = vst [vmem:[%s3790_s10 + $0x90] sm:$0xff] %v2070_v13  ;;  %v1974_v41 = vpop.permute.xlu0 %1973 }
 0x2eb   : > { %v2043_v17 = vmul.f32 %v1974_v41, %v3992_v31  ;;  %v2071_v21 = vsel %vm3781_vm3, %v3700_v9, %v2036_v47 }
 0x2ec   : > { %2103 = vst [vmem:[%s3790_s10 + $0x98] sm:$0xff] %v2071_v21  ;;  %v1976_v44 = vpop.permute.xlu1 %1975 }
 0x2ed   : > { %v2078_v61 = vsel %vm3781_vm3, %v3704_v4, %v2043_v17  ;;  %v2044_v2 = vmul.f32 %v1976_v44, %v3993_v30 }
 0x2ee   : > { %2110 = vst [vmem:[%s3790_s10 + $0xd0] sm:$0xff] %v2078_v61  ;;  %v1970_v48 = vpop.permute.xlu0 %1969 }
 0x2ef   : > { %v2041_v57 = vmul.f32 %v1970_v48, %v3994_v58  ;;  %v2079_v18 = vsel %vm3781_vm3, %v3712_v33, %v2044_v2 }
 0x2f0   : > { %2111 = vst [vmem:[%s3790_s10 + $0xd8] sm:$0xff] %v2079_v18  ;;  %v1972_v12 = vpop.permute.xlu1 %1971 }
 0x2f1   : > { %v2076_v9 = vsel %vm3781_vm3, %v3716_v10, %v2041_v57  ;;  %v2042_v4 = vmul.f32 %v1972_v12, %v3463_v51  ;;  %v3998_v10 = vld [vmem:[#allocation7_spill] sm:$0xff] }
 0x2f2   : > { %2108 = vst [vmem:[%s3790_s10 + $0xc0] sm:$0xff] %v2076_v9  ;;  %v1962_v7 = vpop.permute.xlu0 %1961 }
 0x2f3   : > { %v2037_v20 = vmul.f32 %v1962_v7, %v3995_v29  ;;  %v2077_v0 = vsel %vm3781_vm3, %v3996_v42, %v2042_v4 }
 0x2f4   : > { %2109 = vst [vmem:[%s3790_s10 + $0xc8] sm:$0xff] %v2077_v0  ;;  %v1964_v24 = vpop.permute.xlu1 %1963 }
 0x2f5   : > { %v2072_v33 = vsel %vm3781_vm3, %v3997_v52, %v2037_v20  ;;  %v2038_v54 = vmul.f32 %v1964_v24, %v3998_v10 }
 0x2f6   : > { %2104 = vst [vmem:[%s3790_s10 + $0xa0] sm:$0xff] %v2072_v33 }
 0x2f7   : > { %v2073_v51 = vsel %vm3781_vm3, %v3999_v32, %v2038_v54 }
 0x2f8   : > { %2105 = vst [vmem:[%s3790_s10 + $0xa8] sm:$0xff] %v2073_v51 }
 0x2fa   : > { %v1978_v49 = vpop.permute.xlu0 %1977 }
 0x2fb   : > { %v2045_v19 = vmul.f32 %v1978_v49, %v4000_v22 }
 0x2fc   : > { %v1980_v11 = vpop.permute.xlu1 %1979 }
 0x2fd   : > { %v2080_v60 = vsel %vm3781_vm3, %v3743_v27, %v2045_v19  ;;  %v2046_v35 = vmul.f32 %v1980_v11, %v3499_v23 }
 0x2fe   : > { %2112 = vst [vmem:[%s3790_s10 + $0xe0] sm:$0xff] %v2080_v60  ;;  %v1966_v40 = vpop.permute.xlu0 %1965 }
 0x2ff   : > { %v2039_v46 = vmul.f32 %v1966_v40, %v3505_v1  ;;  %v2081_v39 = vsel %vm3781_vm3, %v3750_v15, %v2046_v35 }
 0x300   : > { %2113 = vst [vmem:[%s3790_s10 + $0xe8] sm:$0xff] %v2081_v39  ;;  %v1968_v50 = vpop.permute.xlu1 %1967 }
 0x301   : > { %v2074_v25 = vsel %vm3781_vm3, %v3754_v53, %v2039_v46  ;;  %v2040_v27 = vmul.f32 %v1968_v50, %v3511_v28 }
 0x302   : > { %2106 = vst [vmem:[%s3790_s10 + $0xb0] sm:$0xff] %v2074_v25  ;;  %v1982_v5 = vpop.permute.xlu0 %1981 }
 0x303   : > { %v2047_v23 = vmul.f32 %v1982_v5, %v3481_v6  ;;  %v2075_v1 = vsel %vm3781_vm3, %v3762_v56, %v2040_v27 }
 0x304   : > { %2107 = vst [vmem:[%s3790_s10 + $0xb8] sm:$0xff] %v2075_v1  ;;  %v1984_v14 = vpop.permute.xlu1 %1983 }
 0x305   : > { %v2082_v15 = vsel %vm3781_vm3, %v3765_v34, %v2047_v23  ;;  %v2048_v53 = vmul.f32 %v1984_v14, %v3487_v43 }
 0x306   : > { %2114 = vst [vmem:[%s3790_s10 + $0xf0] sm:$0xff] %v2082_v15 }
 0x307   : > { %v2083_v28 = vsel %vm3781_vm3, %v3770_v38, %v2048_v53 }
 0x308   : > { %2115 = vst [vmem:[%s3790_s10 + $0xf8] sm:$0xff] %v2083_v28 }
 0x309 PF: > { %s14_s17 = sadd.s32 1, %s2903_s17   ;;  %s4001_s15 = smov %s2899_s16 }
 0x30a   : > { %p11_p5 = scmp.ge.s32.totalorder %s14_s17, 4   ;;  %s4002_s16 = smov %s4004_s18 }
 0x30c   :  { %13 = sbr.rel (!%p11_p5) target bundleno = 2 (0x2), region = 69 }

</bundles_post_ra>
